<compile_context>
chip_gen: v6e
topology: v6e:2x2x1
jax: 0.10.0
libtpu: 0.0.40
codegen_flags: <defaults>
</compile_context>

<pallas_src>
import math
import numpy as np
import jax
import jax.numpy as jnp
from jax import lax
from jax.experimental import pallas as pl
from jax.experimental.pallas import tpu as pltpu

# ------------------------- module configuration -------------------------
IN_DIM = 3
OUT_DIM = 2
TMIN_MS, TMAX_MS, FS = 0.0, 500.0, 64.0
LIMIT = 7                      # limitOfShift_idx
N_BASIS = 21                   # Fourier basis size (1 const + 10 sin + 10 cos)
MAXN = N_BASIS // 2
N_PARAMS = 3                   # mode = 'a,b,c'
N_KERNEL = 2                   # CausalConv kernel size


def msec2idxs(trange_ms, fs):
    lo = int(math.floor(trange_ms[0] / 1000.0 * fs))
    hi = int(math.ceil(trange_ms[1] / 1000.0 * fs))
    return np.arange(lo, hi + 1)


LAG_IDXS = msec2idxs((TMIN_MS, TMAX_MS), FS)
TMIN_IDX = float(LAG_IDXS[0])
TMAX_IDX = float(LAG_IDXS[-1])
NWIN = int(LAG_IDXS.shape[0])                 # non-extended time embedding length (33)
NWIN_EXT = NWIN + 2 * LIMIT                   # extended window (FuncBasisTRF.nWin = 47)
T_PERIOD = float(NWIN_EXT - 1)                # FourierBasisTRF.T = 46
CONST0 = 1.0 / (math.sqrt(2.0) * math.sqrt(T_PERIOD / 2.0))   # phi0(T)
BASIS_SCALE = 1.0 / math.sqrt(T_PERIOD / 2.0)                 # 1/sqrt(T/2)
TWO_PI_OVER_T = 2.0 * math.pi / T_PERIOD

SUB = 128        # register-resident seq sub-chunk (lane width)
TS_CAP = 2048    # max seq tile per grid step (multiple of 128)


def _cdiv(a, b):
    return -(-a // b)


def _pick_seq_tile(n_seq, n_batch):
    """Seq tile: multiple of 128, capped at TS_CAP; for nB==1 split the sequence so the
    grid has at least 2 'parallel' steps (v7x megacore occupancy) when possible."""
    ts = min(TS_CAP, SUB * _cdiv(n_seq, SUB))
    if n_batch == 1 and n_seq > SUB:
        ts = min(ts, SUB * _cdiv(_cdiv(n_seq, 2), SUB))
    return max(ts, SUB)


# ---------------- fused CausalConv + Fourier basis TRF kernel ----------------
def func_trfs_gen_forward(x, conv_w, conv_b, coefs):
    """x: (nB, inDim, nSeq); conv_w: (3, inDim, 2); conv_b: (3,);
    coefs: (outDim, inDim, nBasis) -> TRFs (nB, outDim, nWin, nSeq)."""
    nB, in_dim, n_seq = x.shape
    assert in_dim == IN_DIM

    ts = _pick_seq_tile(n_seq, nB)
    n_tiles = _cdiv(n_seq, ts)
    n_sub = ts // SUB

    # tap-1 input x[t] passes through untouched; only the causal t-1 tap is copied once.
    x_cur = x.astype(jnp.float32)
    x_prev = jnp.pad(x_cur[:, :, :-1], ((0, 0), (0, 0), (1, 0)))

    # ---- host-side coefficient folding (inDim sum + basis scales) ----
    coefs = coefs.astype(jnp.float32)
    c0_fold = (CONST0 * jnp.sum(coefs[:, :, 0], axis=1)).reshape(-1)            # (O,)
    cs_fold = (BASIS_SCALE * jnp.sum(coefs[:, :, 1::2], axis=1)).reshape(-1)    # (O*MAXN,)
    cc_fold = (BASIS_SCALE * jnp.sum(coefs[:, :, 2::2], axis=1)).reshape(-1)    # (O*MAXN,)

    w_flat = conv_w.reshape(-1).astype(jnp.float32)                             # (3*inDim*2,)
    b_flat = conv_b.astype(jnp.float32)                                         # (3,)

    def kernel(w_ref, cb_ref, c0_ref, cs_ref, cc_ref, xp_ref, xc_ref, out_ref):
        # window time indices, loop-invariant -> hoisted out of the sub-chunk loop
        t_win = TMIN_IDX + lax.broadcasted_iota(jnp.int32, (NWIN, SUB), 0).astype(jnp.float32)

        @pl.loop(0, n_sub)
        def _(j):
            off = pl.multiple_of(j * SUB, SUB)

            # ---- 1) fused CausalConv (3 params x inDim x 2 taps) + nonlinearities ----
            xprev = [xp_ref[0, pl.ds(c, 1), pl.ds(off, SUB)] for c in range(IN_DIM)]  # x[t-1]
            xcur = [xc_ref[0, pl.ds(c, 1), pl.ds(off, SUB)] for c in range(IN_DIM)]   # x[t]
            rows = []
            for p in range(N_PARAMS):
                row = jnp.zeros((1, SUB), jnp.float32) + cb_ref[p]
                for c in range(IN_DIM):
                    base = (p * IN_DIM + c) * N_KERNEL
                    row = row + w_ref[base] * xprev[c] + w_ref[base + 1] * xcur[c]
                rows.append(row)
            a_row = jnp.abs(rows[0])                                   # 'a': abs
            b_row = jnp.clip(rows[1], -float(LIMIT), float(LIMIT))     # 'b': clamp +-limit
            c_row = jnp.clip(1.0 + rows[2], 0.5, 1.28)                 # 'c': 1+c, clamp
            # fold 2*pi/T and the b-shift onto the cheap (1, SUB) rows
            c_scaled = TWO_PI_OVER_T * c_row                           # (1, SUB)
            phase0 = c_scaled * b_row                                  # (1, SUB)

            # ---- 2) Fourier basis: fundamental trig once, harmonics via recurrence ----
            w1 = c_scaled * t_win - phase0                             # (NWIN, SUB)
            sin1 = jnp.sin(w1)
            cos1 = jnp.cos(w1)
            sk, ck = sin1, cos1
            acc = [jnp.zeros((NWIN, SUB), jnp.float32) + c0_ref[o] for o in range(OUT_DIM)]
            for k in range(MAXN):
                if k > 0:
                    # angle-addition: sin((k+1)w), cos((k+1)w)
                    sk, ck = sk * cos1 + ck * sin1, ck * cos1 - sk * sin1
                for o in range(OUT_DIM):
                    acc[o] = acc[o] + cs_ref[o * MAXN + k] * sk + cc_ref[o * MAXN + k] * ck

            for o in range(OUT_DIM):
                out_ref[0, o, :, pl.ds(off, SUB)] = (a_row * acc[o]).astype(out_ref.dtype)

    out_bytes = nB * OUT_DIM * NWIN * n_seq * 4
    in_bytes = 2 * nB * IN_DIM * n_seq * 4
    cost = pl.CostEstimate(
        flops=140 * nB * NWIN * n_seq,
        transcendentals=2 * nB * NWIN * n_seq,
        bytes_accessed=out_bytes + in_bytes,
    )

    out = pl.pallas_call(
        kernel,
        out_shape=jax.ShapeDtypeStruct((nB, OUT_DIM, NWIN, n_seq), jnp.float32),
        grid=(nB, n_tiles),
        in_specs=[
            pl.BlockSpec(memory_space=pltpu.MemorySpace.SMEM),   # conv weights (scalars)
            pl.BlockSpec(memory_space=pltpu.MemorySpace.SMEM),   # conv bias
            pl.BlockSpec(memory_space=pltpu.MemorySpace.SMEM),   # folded const coef
            pl.BlockSpec(memory_space=pltpu.MemorySpace.SMEM),   # folded sin coefs
            pl.BlockSpec(memory_space=pltpu.MemorySpace.SMEM),   # folded cos coefs
            pl.BlockSpec((1, IN_DIM, ts), lambda b, s: (b, 0, s)),   # x[t-1]
            pl.BlockSpec((1, IN_DIM, ts), lambda b, s: (b, 0, s)),   # x[t]
        ],
        # NWIN(=33) equals the full array dim -> legal block; ragged seq tile is masked.
        out_specs=pl.BlockSpec((1, OUT_DIM, NWIN, ts), lambda b, s: (b, 0, 0, s)),
        compiler_params=pltpu.CompilerParams(
            dimension_semantics=("parallel", "parallel"),
            vmem_limit_bytes=32 * 1024 * 1024),
        cost_estimate=cost,
    )(w_flat, b_flat, c0_fold, cs_fold, cc_fold, x_prev, x_cur)

    return out


# ------------------------- pure-JAX reference (mirrors the torch code) -------------------------
def reference_forward(x, conv_w, conv_b, coefs):
    n_seq = x.shape[-1]
    xpad = jnp.pad(x, ((0, 0), (0, 0), (N_KERNEL - 1, 0)))
    y = (jnp.einsum('pc,bcs->bps', conv_w[:, :, 0], xpad[:, :, :n_seq])
         + jnp.einsum('pc,bcs->bps', conv_w[:, :, 1], xpad[:, :, 1:n_seq + 1])
         + conv_b[None, :, None])
    a = jnp.abs(y[:, 0])
    b = jnp.clip(y[:, 1], -float(LIMIT), float(LIMIT))
    c = jnp.clip(1.0 + y[:, 2], 0.5, 1.28)
    t = jnp.arange(TMIN_IDX, TMAX_IDX + 1.0, dtype=jnp.float32)                 # (nWin,)
    phase = c[:, None, :] * (t[None, :, None] - b[:, None, :])                  # (nB, nWin, nSeq)
    n = jnp.arange(1, MAXN + 1, dtype=jnp.float32)
    ang = 2.0 * jnp.pi * phase[..., None] * n / T_PERIOD                        # (nB, nWin, nSeq, MAXN)
    sin = jnp.sin(ang) / jnp.sqrt(T_PERIOD / 2.0)
    cos = jnp.cos(ang) / jnp.sqrt(T_PERIOD / 2.0)
    constN = jnp.stack([sin, cos], axis=-1).reshape(*phase.shape, 2 * MAXN)
    out5 = CONST0 * coefs[None, :, :, None, None, 0] \
        + jnp.einsum('bwsn,oin->boiws', constN, coefs[:, :, 1:])
    return (a[:, None, None, None, :] * out5).sum(2)                            # (nB, outDim, nWin, nSeq)


if __name__ == "__main__":
    key = jax.random.PRNGKey(0)
    k1, k2, k3, k4 = jax.random.split(key, 4)
    nBatch, nSeq = 2, 16
    x = jax.random.normal(k1, (nBatch, IN_DIM, nSeq), jnp.float32)
    # deterministic parameter init (synthetic weights, no checkpoint)
    conv_w = 0.3 * jax.random.normal(k2, (N_PARAMS, IN_DIM, N_KERNEL), jnp.float32)
    conv_b = 0.1 * jax.random.normal(k3, (N_PARAMS,), jnp.float32)
    coefs = 0.5 * jax.random.normal(k4, (OUT_DIM, IN_DIM, N_BASIS), jnp.float32)

    out = jax.block_until_ready(func_trfs_gen_forward(x, conv_w, conv_b, coefs))
    assert out.shape == (nBatch, OUT_DIM, NWIN, nSeq), out.shape
    ref = reference_forward(x, conv_w, conv_b, coefs)
    np.testing.assert_allclose(np.asarray(out), np.asarray(ref), rtol=1e-4, atol=1e-4)

    # multi-tile + ragged-seq check: nSeq not a multiple of 128 or 512, two seq tiles,
    # exercises the in-kernel sub-chunk loop and the masked write-back of the last tile.
    nSeq2 = 2100
    x2 = jax.random.normal(k1, (nBatch, IN_DIM, nSeq2), jnp.float32)
    out2 = jax.block_until_ready(func_trfs_gen_forward(x2, conv_w, conv_b, coefs))
    assert out2.shape == (nBatch, OUT_DIM, NWIN, nSeq2), out2.shape
    ref2 = reference_forward(x2, conv_w, conv_b, coefs)
    np.testing.assert_allclose(np.asarray(out2), np.asarray(ref2), rtol=1e-4, atol=1e-4)

    print("KERNEL_OK")
</pallas_src>

<mosaic_0001>
module attributes {stable_mosaic.version = 11 : i64} {
  func.func @kernel(%arg0: i32, %arg1: i32, %arg2: memref<18xf32, #tpu.memory_space<smem>>, %arg3: memref<3xf32, #tpu.memory_space<smem>>, %arg4: memref<2xf32, #tpu.memory_space<smem>>, %arg5: memref<20xf32, #tpu.memory_space<smem>>, %arg6: memref<20xf32, #tpu.memory_space<smem>>, %arg7: memref<1x3x128xf32, #tpu.memory_space<vmem>>, %arg8: memref<1x3x128xf32, #tpu.memory_space<vmem>>, %arg9: memref<1x2x33x128xf32, #tpu.memory_space<vmem>>) attributes {dimension_semantics = [#tpu.dimension_semantics<parallel>, #tpu.dimension_semantics<parallel>], iteration_bounds = array<i64: 2, 1>, scalar_prefetch = 0 : i64, scratch_operands = 0 : i64, tpu.core_type = #tpu.core_type<tc>, window_params = [{transform_indices = @transform_0, window_bounds = array<i64: 18>}, {transform_indices = @transform_1, window_bounds = array<i64: 3>}, {transform_indices = @transform_2, window_bounds = array<i64: 2>}, {transform_indices = @transform_3, window_bounds = array<i64: 20>}, {transform_indices = @transform_4, window_bounds = array<i64: 20>}, {transform_indices = @transform_5, window_bounds = array<i64: 1, 3, 128>}, {transform_indices = @transform_6, window_bounds = array<i64: 1, 3, 128>}, {transform_indices = @transform_7, window_bounds = array<i64: 1, 2, 33, 128>}]} {
    %0 = tpu.iota {dimensions = array<i32: 0>} : vector<33x128xi32>
    %1 = arith.sitofp %0 : vector<33x128xi32> to vector<33x128xf32>
    %cst = arith.constant 0.000000e+00 : f32
    %2 = vector.broadcast %cst : f32 to vector<33x128xf32>
    %3 = arith.addf %2, %1 : vector<33x128xf32>
    %c0_i32 = arith.constant 0 : i32
    %c1_i32 = arith.constant 1 : i32
    %4 = arith.muli %c0_i32, %c1_i32 : i32
    %c0_i32_0 = arith.constant 0 : i32
    %5 = arith.addi %c0_i32_0, %4 : i32
    %c128_i32 = arith.constant 128 : i32
    %6 = arith.muli %5, %c128_i32 : i32
    %7 = tpu.assume_multiple %6, 128 : i32
    %c0 = arith.constant 0 : index
    %c0_1 = arith.constant 0 : index
    %8 = arith.index_cast %7 : i32 to index
    %9 = vector.load %arg7[%c0, %c0_1, %8] : memref<1x3x128xf32, #tpu.memory_space<vmem>>, vector<1x1x128xf32>
    %10 = vector.shape_cast %9 : vector<1x1x128xf32> to vector<1x128xf32>
    %c0_2 = arith.constant 0 : index
    %c1 = arith.constant 1 : index
    %11 = arith.index_cast %7 : i32 to index
    %12 = vector.load %arg7[%c0_2, %c1, %11] : memref<1x3x128xf32, #tpu.memory_space<vmem>>, vector<1x1x128xf32>
    %13 = vector.shape_cast %12 : vector<1x1x128xf32> to vector<1x128xf32>
    %c0_3 = arith.constant 0 : index
    %c2 = arith.constant 2 : index
    %14 = arith.index_cast %7 : i32 to index
    %15 = vector.load %arg7[%c0_3, %c2, %14] : memref<1x3x128xf32, #tpu.memory_space<vmem>>, vector<1x1x128xf32>
    %16 = vector.shape_cast %15 : vector<1x1x128xf32> to vector<1x128xf32>
    %c0_4 = arith.constant 0 : index
    %c0_5 = arith.constant 0 : index
    %17 = arith.index_cast %7 : i32 to index
    %18 = vector.load %arg8[%c0_4, %c0_5, %17] : memref<1x3x128xf32, #tpu.memory_space<vmem>>, vector<1x1x128xf32>
    %19 = vector.shape_cast %18 : vector<1x1x128xf32> to vector<1x128xf32>
    %c0_6 = arith.constant 0 : index
    %c1_7 = arith.constant 1 : index
    %20 = arith.index_cast %7 : i32 to index
    %21 = vector.load %arg8[%c0_6, %c1_7, %20] : memref<1x3x128xf32, #tpu.memory_space<vmem>>, vector<1x1x128xf32>
    %22 = vector.shape_cast %21 : vector<1x1x128xf32> to vector<1x128xf32>
    %c0_8 = arith.constant 0 : index
    %c2_9 = arith.constant 2 : index
    %23 = arith.index_cast %7 : i32 to index
    %24 = vector.load %arg8[%c0_8, %c2_9, %23] : memref<1x3x128xf32, #tpu.memory_space<vmem>>, vector<1x1x128xf32>
    %25 = vector.shape_cast %24 : vector<1x1x128xf32> to vector<1x128xf32>
    %cst_10 = arith.constant 0.000000e+00 : f32
    %26 = vector.broadcast %cst_10 : f32 to vector<1x128xf32>
    %c0_11 = arith.constant 0 : index
    %27 = memref.load %arg3[%c0_11] : memref<3xf32, #tpu.memory_space<smem>>
    %28 = vector.broadcast %27 : f32 to vector<1x128xf32>
    %29 = arith.addf %26, %28 : vector<1x128xf32>
    %c0_12 = arith.constant 0 : index
    %30 = memref.load %arg2[%c0_12] : memref<18xf32, #tpu.memory_space<smem>>
    %31 = vector.broadcast %30 : f32 to vector<1x128xf32>
    %32 = arith.mulf %31, %10 : vector<1x128xf32>
    %33 = arith.addf %29, %32 : vector<1x128xf32>
    %c1_13 = arith.constant 1 : index
    %34 = memref.load %arg2[%c1_13] : memref<18xf32, #tpu.memory_space<smem>>
    %35 = vector.broadcast %34 : f32 to vector<1x128xf32>
    %36 = arith.mulf %35, %19 : vector<1x128xf32>
    %37 = arith.addf %33, %36 : vector<1x128xf32>
    %c2_14 = arith.constant 2 : index
    %38 = memref.load %arg2[%c2_14] : memref<18xf32, #tpu.memory_space<smem>>
    %39 = vector.broadcast %38 : f32 to vector<1x128xf32>
    %40 = arith.mulf %39, %13 : vector<1x128xf32>
    %41 = arith.addf %37, %40 : vector<1x128xf32>
    %c3 = arith.constant 3 : index
    %42 = memref.load %arg2[%c3] : memref<18xf32, #tpu.memory_space<smem>>
    %43 = vector.broadcast %42 : f32 to vector<1x128xf32>
    %44 = arith.mulf %43, %22 : vector<1x128xf32>
    %45 = arith.addf %41, %44 : vector<1x128xf32>
    %c4 = arith.constant 4 : index
    %46 = memref.load %arg2[%c4] : memref<18xf32, #tpu.memory_space<smem>>
    %47 = vector.broadcast %46 : f32 to vector<1x128xf32>
    %48 = arith.mulf %47, %16 : vector<1x128xf32>
    %49 = arith.addf %45, %48 : vector<1x128xf32>
    %c5 = arith.constant 5 : index
    %50 = memref.load %arg2[%c5] : memref<18xf32, #tpu.memory_space<smem>>
    %51 = vector.broadcast %50 : f32 to vector<1x128xf32>
    %52 = arith.mulf %51, %25 : vector<1x128xf32>
    %53 = arith.addf %49, %52 : vector<1x128xf32>
    %cst_15 = arith.constant 0.000000e+00 : f32
    %54 = vector.broadcast %cst_15 : f32 to vector<1x128xf32>
    %c1_16 = arith.constant 1 : index
    %55 = memref.load %arg3[%c1_16] : memref<3xf32, #tpu.memory_space<smem>>
    %56 = vector.broadcast %55 : f32 to vector<1x128xf32>
    %57 = arith.addf %54, %56 : vector<1x128xf32>
    %c6 = arith.constant 6 : index
    %58 = memref.load %arg2[%c6] : memref<18xf32, #tpu.memory_space<smem>>
    %59 = vector.broadcast %58 : f32 to vector<1x128xf32>
    %60 = arith.mulf %59, %10 : vector<1x128xf32>
    %61 = arith.addf %57, %60 : vector<1x128xf32>
    %c7 = arith.constant 7 : index
    %62 = memref.load %arg2[%c7] : memref<18xf32, #tpu.memory_space<smem>>
    %63 = vector.broadcast %62 : f32 to vector<1x128xf32>
    %64 = arith.mulf %63, %19 : vector<1x128xf32>
    %65 = arith.addf %61, %64 : vector<1x128xf32>
    %c8 = arith.constant 8 : index
    %66 = memref.load %arg2[%c8] : memref<18xf32, #tpu.memory_space<smem>>
    %67 = vector.broadcast %66 : f32 to vector<1x128xf32>
    %68 = arith.mulf %67, %13 : vector<1x128xf32>
    %69 = arith.addf %65, %68 : vector<1x128xf32>
    %c9 = arith.constant 9 : index
    %70 = memref.load %arg2[%c9] : memref<18xf32, #tpu.memory_space<smem>>
    %71 = vector.broadcast %70 : f32 to vector<1x128xf32>
    %72 = arith.mulf %71, %22 : vector<1x128xf32>
    %73 = arith.addf %69, %72 : vector<1x128xf32>
    %c10 = arith.constant 10 : index
    %74 = memref.load %arg2[%c10] : memref<18xf32, #tpu.memory_space<smem>>
    %75 = vector.broadcast %74 : f32 to vector<1x128xf32>
    %76 = arith.mulf %75, %16 : vector<1x128xf32>
    %77 = arith.addf %73, %76 : vector<1x128xf32>
    %c11 = arith.constant 11 : index
    %78 = memref.load %arg2[%c11] : memref<18xf32, #tpu.memory_space<smem>>
    %79 = vector.broadcast %78 : f32 to vector<1x128xf32>
    %80 = arith.mulf %79, %25 : vector<1x128xf32>
    %81 = arith.addf %77, %80 : vector<1x128xf32>
    %cst_17 = arith.constant 0.000000e+00 : f32
    %82 = vector.broadcast %cst_17 : f32 to vector<1x128xf32>
    %c2_18 = arith.constant 2 : index
    %83 = memref.load %arg3[%c2_18] : memref<3xf32, #tpu.memory_space<smem>>
    %84 = vector.broadcast %83 : f32 to vector<1x128xf32>
    %85 = arith.addf %82, %84 : vector<1x128xf32>
    %c12 = arith.constant 12 : index
    %86 = memref.load %arg2[%c12] : memref<18xf32, #tpu.memory_space<smem>>
    %87 = vector.broadcast %86 : f32 to vector<1x128xf32>
    %88 = arith.mulf %87, %10 : vector<1x128xf32>
    %89 = arith.addf %85, %88 : vector<1x128xf32>
    %c13 = arith.constant 13 : index
    %90 = memref.load %arg2[%c13] : memref<18xf32, #tpu.memory_space<smem>>
    %91 = vector.broadcast %90 : f32 to vector<1x128xf32>
    %92 = arith.mulf %91, %19 : vector<1x128xf32>
    %93 = arith.addf %89, %92 : vector<1x128xf32>
    %c14 = arith.constant 14 : index
    %94 = memref.load %arg2[%c14] : memref<18xf32, #tpu.memory_space<smem>>
    %95 = vector.broadcast %94 : f32 to vector<1x128xf32>
    %96 = arith.mulf %95, %13 : vector<1x128xf32>
    %97 = arith.addf %93, %96 : vector<1x128xf32>
    %c15 = arith.constant 15 : index
    %98 = memref.load %arg2[%c15] : memref<18xf32, #tpu.memory_space<smem>>
    %99 = vector.broadcast %98 : f32 to vector<1x128xf32>
    %100 = arith.mulf %99, %22 : vector<1x128xf32>
    %101 = arith.addf %97, %100 : vector<1x128xf32>
    %c16 = arith.constant 16 : index
    %102 = memref.load %arg2[%c16] : memref<18xf32, #tpu.memory_space<smem>>
    %103 = vector.broadcast %102 : f32 to vector<1x128xf32>
    %104 = arith.mulf %103, %16 : vector<1x128xf32>
    %105 = arith.addf %101, %104 : vector<1x128xf32>
    %c17 = arith.constant 17 : index
    %106 = memref.load %arg2[%c17] : memref<18xf32, #tpu.memory_space<smem>>
    %107 = vector.broadcast %106 : f32 to vector<1x128xf32>
    %108 = arith.mulf %107, %25 : vector<1x128xf32>
    %109 = arith.addf %105, %108 : vector<1x128xf32>
    %110 = math.absf %53 : vector<1x128xf32>
    %cst_19 = arith.constant -7.000000e+00 : f32
    %cst_20 = arith.constant 7.000000e+00 : f32
    %111 = vector.broadcast %cst_19 : f32 to vector<1x128xf32>
    %112 = arith.maximumf %111, %81 : vector<1x128xf32>
    %113 = vector.broadcast %cst_20 : f32 to vector<1x128xf32>
    %114 = arith.minimumf %113, %112 : vector<1x128xf32>
    %cst_21 = arith.constant 1.000000e+00 : f32
    %115 = vector.broadcast %cst_21 : f32 to vector<1x128xf32>
    %116 = arith.addf %115, %109 : vector<1x128xf32>
    %cst_22 = arith.constant 5.000000e-01 : f32
    %cst_23 = arith.constant 1.280000e+00 : f32
    %117 = vector.broadcast %cst_22 : f32 to vector<1x128xf32>
    %118 = arith.maximumf %117, %116 : vector<1x128xf32>
    %119 = vector.broadcast %cst_23 : f32 to vector<1x128xf32>
    %120 = arith.minimumf %119, %118 : vector<1x128xf32>
    %cst_24 = arith.constant 0.136590987 : f32
    %121 = vector.broadcast %cst_24 : f32 to vector<1x128xf32>
    %122 = arith.mulf %121, %120 : vector<1x128xf32>
    %123 = arith.mulf %122, %114 : vector<1x128xf32>
    %124 = vector.broadcast %122 : vector<1x128xf32> to vector<33x128xf32>
    %125 = arith.mulf %124, %3 : vector<33x128xf32>
    %126 = vector.broadcast %123 : vector<1x128xf32> to vector<33x128xf32>
    %127 = arith.subf %125, %126 : vector<33x128xf32>
    %128 = math.sin %127 : vector<33x128xf32>
    %129 = math.cos %127 : vector<33x128xf32>
    %cst_25 = arith.constant 0.000000e+00 : f32
    %130 = vector.broadcast %cst_25 : f32 to vector<33x128xf32>
    %c0_26 = arith.constant 0 : index
    %131 = memref.load %arg4[%c0_26] : memref<2xf32, #tpu.memory_space<smem>>
    %132 = vector.broadcast %131 : f32 to vector<33x128xf32>
    %133 = arith.addf %130, %132 : vector<33x128xf32>
    %cst_27 = arith.constant 0.000000e+00 : f32
    %134 = vector.broadcast %cst_27 : f32 to vector<33x128xf32>
    %c1_28 = arith.constant 1 : index
    %135 = memref.load %arg4[%c1_28] : memref<2xf32, #tpu.memory_space<smem>>
    %136 = vector.broadcast %135 : f32 to vector<33x128xf32>
    %137 = arith.addf %134, %136 : vector<33x128xf32>
    %c0_29 = arith.constant 0 : index
    %138 = memref.load %arg5[%c0_29] : memref<20xf32, #tpu.memory_space<smem>>
    %139 = vector.broadcast %138 : f32 to vector<33x128xf32>
    %140 = arith.mulf %139, %128 : vector<33x128xf32>
    %141 = arith.addf %133, %140 : vector<33x128xf32>
    %c0_30 = arith.constant 0 : index
    %142 = memref.load %arg6[%c0_30] : memref<20xf32, #tpu.memory_space<smem>>
    %143 = vector.broadcast %142 : f32 to vector<33x128xf32>
    %144 = arith.mulf %143, %129 : vector<33x128xf32>
    %145 = arith.addf %141, %144 : vector<33x128xf32>
    %c10_31 = arith.constant 10 : index
    %146 = memref.load %arg5[%c10_31] : memref<20xf32, #tpu.memory_space<smem>>
    %147 = vector.broadcast %146 : f32 to vector<33x128xf32>
    %148 = arith.mulf %147, %128 : vector<33x128xf32>
    %149 = arith.addf %137, %148 : vector<33x128xf32>
    %c10_32 = arith.constant 10 : index
    %150 = memref.load %arg6[%c10_32] : memref<20xf32, #tpu.memory_space<smem>>
    %151 = vector.broadcast %150 : f32 to vector<33x128xf32>
    %152 = arith.mulf %151, %129 : vector<33x128xf32>
    %153 = arith.addf %149, %152 : vector<33x128xf32>
    %154 = arith.mulf %128, %129 : vector<33x128xf32>
    %155 = arith.mulf %129, %128 : vector<33x128xf32>
    %156 = arith.addf %154, %155 : vector<33x128xf32>
    %157 = arith.mulf %129, %129 : vector<33x128xf32>
    %158 = arith.mulf %128, %128 : vector<33x128xf32>
    %159 = arith.subf %157, %158 : vector<33x128xf32>
    %c1_33 = arith.constant 1 : index
    %160 = memref.load %arg5[%c1_33] : memref<20xf32, #tpu.memory_space<smem>>
    %161 = vector.broadcast %160 : f32 to vector<33x128xf32>
    %162 = arith.mulf %161, %156 : vector<33x128xf32>
    %163 = arith.addf %145, %162 : vector<33x128xf32>
    %c1_34 = arith.constant 1 : index
    %164 = memref.load %arg6[%c1_34] : memref<20xf32, #tpu.memory_space<smem>>
    %165 = vector.broadcast %164 : f32 to vector<33x128xf32>
    %166 = arith.mulf %165, %159 : vector<33x128xf32>
    %167 = arith.addf %163, %166 : vector<33x128xf32>
    %c11_35 = arith.constant 11 : index
    %168 = memref.load %arg5[%c11_35] : memref<20xf32, #tpu.memory_space<smem>>
    %169 = vector.broadcast %168 : f32 to vector<33x128xf32>
    %170 = arith.mulf %169, %156 : vector<33x128xf32>
    %171 = arith.addf %153, %170 : vector<33x128xf32>
    %c11_36 = arith.constant 11 : index
    %172 = memref.load %arg6[%c11_36] : memref<20xf32, #tpu.memory_space<smem>>
    %173 = vector.broadcast %172 : f32 to vector<33x128xf32>
    %174 = arith.mulf %173, %159 : vector<33x128xf32>
    %175 = arith.addf %171, %174 : vector<33x128xf32>
    %176 = arith.mulf %156, %129 : vector<33x128xf32>
    %177 = arith.mulf %159, %128 : vector<33x128xf32>
    %178 = arith.addf %176, %177 : vector<33x128xf32>
    %179 = arith.mulf %159, %129 : vector<33x128xf32>
    %180 = arith.mulf %156, %128 : vector<33x128xf32>
    %181 = arith.subf %179, %180 : vector<33x128xf32>
    %c2_37 = arith.constant 2 : index
    %182 = memref.load %arg5[%c2_37] : memref<20xf32, #tpu.memory_space<smem>>
    %183 = vector.broadcast %182 : f32 to vector<33x128xf32>
    %184 = arith.mulf %183, %178 : vector<33x128xf32>
    %185 = arith.addf %167, %184 : vector<33x128xf32>
    %c2_38 = arith.constant 2 : index
    %186 = memref.load %arg6[%c2_38] : memref<20xf32, #tpu.memory_space<smem>>
    %187 = vector.broadcast %186 : f32 to vector<33x128xf32>
    %188 = arith.mulf %187, %181 : vector<33x128xf32>
    %189 = arith.addf %185, %188 : vector<33x128xf32>
    %c12_39 = arith.constant 12 : index
    %190 = memref.load %arg5[%c12_39] : memref<20xf32, #tpu.memory_space<smem>>
    %191 = vector.broadcast %190 : f32 to vector<33x128xf32>
    %192 = arith.mulf %191, %178 : vector<33x128xf32>
    %193 = arith.addf %175, %192 : vector<33x128xf32>
    %c12_40 = arith.constant 12 : index
    %194 = memref.load %arg6[%c12_40] : memref<20xf32, #tpu.memory_space<smem>>
    %195 = vector.broadcast %194 : f32 to vector<33x128xf32>
    %196 = arith.mulf %195, %181 : vector<33x128xf32>
    %197 = arith.addf %193, %196 : vector<33x128xf32>
    %198 = arith.mulf %178, %129 : vector<33x128xf32>
    %199 = arith.mulf %181, %128 : vector<33x128xf32>
    %200 = arith.addf %198, %199 : vector<33x128xf32>
    %201 = arith.mulf %181, %129 : vector<33x128xf32>
    %202 = arith.mulf %178, %128 : vector<33x128xf32>
    %203 = arith.subf %201, %202 : vector<33x128xf32>
    %c3_41 = arith.constant 3 : index
    %204 = memref.load %arg5[%c3_41] : memref<20xf32, #tpu.memory_space<smem>>
    %205 = vector.broadcast %204 : f32 to vector<33x128xf32>
    %206 = arith.mulf %205, %200 : vector<33x128xf32>
    %207 = arith.addf %189, %206 : vector<33x128xf32>
    %c3_42 = arith.constant 3 : index
    %208 = memref.load %arg6[%c3_42] : memref<20xf32, #tpu.memory_space<smem>>
    %209 = vector.broadcast %208 : f32 to vector<33x128xf32>
    %210 = arith.mulf %209, %203 : vector<33x128xf32>
    %211 = arith.addf %207, %210 : vector<33x128xf32>
    %c13_43 = arith.constant 13 : index
    %212 = memref.load %arg5[%c13_43] : memref<20xf32, #tpu.memory_space<smem>>
    %213 = vector.broadcast %212 : f32 to vector<33x128xf32>
    %214 = arith.mulf %213, %200 : vector<33x128xf32>
    %215 = arith.addf %197, %214 : vector<33x128xf32>
    %c13_44 = arith.constant 13 : index
    %216 = memref.load %arg6[%c13_44] : memref<20xf32, #tpu.memory_space<smem>>
    %217 = vector.broadcast %216 : f32 to vector<33x128xf32>
    %218 = arith.mulf %217, %203 : vector<33x128xf32>
    %219 = arith.addf %215, %218 : vector<33x128xf32>
    %220 = arith.mulf %200, %129 : vector<33x128xf32>
    %221 = arith.mulf %203, %128 : vector<33x128xf32>
    %222 = arith.addf %220, %221 : vector<33x128xf32>
    %223 = arith.mulf %203, %129 : vector<33x128xf32>
    %224 = arith.mulf %200, %128 : vector<33x128xf32>
    %225 = arith.subf %223, %224 : vector<33x128xf32>
    %c4_45 = arith.constant 4 : index
    %226 = memref.load %arg5[%c4_45] : memref<20xf32, #tpu.memory_space<smem>>
    %227 = vector.broadcast %226 : f32 to vector<33x128xf32>
    %228 = arith.mulf %227, %222 : vector<33x128xf32>
    %229 = arith.addf %211, %228 : vector<33x128xf32>
    %c4_46 = arith.constant 4 : index
    %230 = memref.load %arg6[%c4_46] : memref<20xf32, #tpu.memory_space<smem>>
    %231 = vector.broadcast %230 : f32 to vector<33x128xf32>
    %232 = arith.mulf %231, %225 : vector<33x128xf32>
    %233 = arith.addf %229, %232 : vector<33x128xf32>
    %c14_47 = arith.constant 14 : index
    %234 = memref.load %arg5[%c14_47] : memref<20xf32, #tpu.memory_space<smem>>
    %235 = vector.broadcast %234 : f32 to vector<33x128xf32>
    %236 = arith.mulf %235, %222 : vector<33x128xf32>
    %237 = arith.addf %219, %236 : vector<33x128xf32>
    %c14_48 = arith.constant 14 : index
    %238 = memref.load %arg6[%c14_48] : memref<20xf32, #tpu.memory_space<smem>>
    %239 = vector.broadcast %238 : f32 to vector<33x128xf32>
    %240 = arith.mulf %239, %225 : vector<33x128xf32>
    %241 = arith.addf %237, %240 : vector<33x128xf32>
    %242 = arith.mulf %222, %129 : vector<33x128xf32>
    %243 = arith.mulf %225, %128 : vector<33x128xf32>
    %244 = arith.addf %242, %243 : vector<33x128xf32>
    %245 = arith.mulf %225, %129 : vector<33x128xf32>
    %246 = arith.mulf %222, %128 : vector<33x128xf32>
    %247 = arith.subf %245, %246 : vector<33x128xf32>
    %c5_49 = arith.constant 5 : index
    %248 = memref.load %arg5[%c5_49] : memref<20xf32, #tpu.memory_space<smem>>
    %249 = vector.broadcast %248 : f32 to vector<33x128xf32>
    %250 = arith.mulf %249, %244 : vector<33x128xf32>
    %251 = arith.addf %233, %250 : vector<33x128xf32>
    %c5_50 = arith.constant 5 : index
    %252 = memref.load %arg6[%c5_50] : memref<20xf32, #tpu.memory_space<smem>>
    %253 = vector.broadcast %252 : f32 to vector<33x128xf32>
    %254 = arith.mulf %253, %247 : vector<33x128xf32>
    %255 = arith.addf %251, %254 : vector<33x128xf32>
    %c15_51 = arith.constant 15 : index
    %256 = memref.load %arg5[%c15_51] : memref<20xf32, #tpu.memory_space<smem>>
    %257 = vector.broadcast %256 : f32 to vector<33x128xf32>
    %258 = arith.mulf %257, %244 : vector<33x128xf32>
    %259 = arith.addf %241, %258 : vector<33x128xf32>
    %c15_52 = arith.constant 15 : index
    %260 = memref.load %arg6[%c15_52] : memref<20xf32, #tpu.memory_space<smem>>
    %261 = vector.broadcast %260 : f32 to vector<33x128xf32>
    %262 = arith.mulf %261, %247 : vector<33x128xf32>
    %263 = arith.addf %259, %262 : vector<33x128xf32>
    %264 = arith.mulf %244, %129 : vector<33x128xf32>
    %265 = arith.mulf %247, %128 : vector<33x128xf32>
    %266 = arith.addf %264, %265 : vector<33x128xf32>
    %267 = arith.mulf %247, %129 : vector<33x128xf32>
    %268 = arith.mulf %244, %128 : vector<33x128xf32>
    %269 = arith.subf %267, %268 : vector<33x128xf32>
    %c6_53 = arith.constant 6 : index
    %270 = memref.load %arg5[%c6_53] : memref<20xf32, #tpu.memory_space<smem>>
    %271 = vector.broadcast %270 : f32 to vector<33x128xf32>
    %272 = arith.mulf %271, %266 : vector<33x128xf32>
    %273 = arith.addf %255, %272 : vector<33x128xf32>
    %c6_54 = arith.constant 6 : index
    %274 = memref.load %arg6[%c6_54] : memref<20xf32, #tpu.memory_space<smem>>
    %275 = vector.broadcast %274 : f32 to vector<33x128xf32>
    %276 = arith.mulf %275, %269 : vector<33x128xf32>
    %277 = arith.addf %273, %276 : vector<33x128xf32>
    %c16_55 = arith.constant 16 : index
    %278 = memref.load %arg5[%c16_55] : memref<20xf32, #tpu.memory_space<smem>>
    %279 = vector.broadcast %278 : f32 to vector<33x128xf32>
    %280 = arith.mulf %279, %266 : vector<33x128xf32>
    %281 = arith.addf %263, %280 : vector<33x128xf32>
    %c16_56 = arith.constant 16 : index
    %282 = memref.load %arg6[%c16_56] : memref<20xf32, #tpu.memory_space<smem>>
    %283 = vector.broadcast %282 : f32 to vector<33x128xf32>
    %284 = arith.mulf %283, %269 : vector<33x128xf32>
    %285 = arith.addf %281, %284 : vector<33x128xf32>
    %286 = arith.mulf %266, %129 : vector<33x128xf32>
    %287 = arith.mulf %269, %128 : vector<33x128xf32>
    %288 = arith.addf %286, %287 : vector<33x128xf32>
    %289 = arith.mulf %269, %129 : vector<33x128xf32>
    %290 = arith.mulf %266, %128 : vector<33x128xf32>
    %291 = arith.subf %289, %290 : vector<33x128xf32>
    %c7_57 = arith.constant 7 : index
    %292 = memref.load %arg5[%c7_57] : memref<20xf32, #tpu.memory_space<smem>>
    %293 = vector.broadcast %292 : f32 to vector<33x128xf32>
    %294 = arith.mulf %293, %288 : vector<33x128xf32>
    %295 = arith.addf %277, %294 : vector<33x128xf32>
    %c7_58 = arith.constant 7 : index
    %296 = memref.load %arg6[%c7_58] : memref<20xf32, #tpu.memory_space<smem>>
    %297 = vector.broadcast %296 : f32 to vector<33x128xf32>
    %298 = arith.mulf %297, %291 : vector<33x128xf32>
    %299 = arith.addf %295, %298 : vector<33x128xf32>
    %c17_59 = arith.constant 17 : index
    %300 = memref.load %arg5[%c17_59] : memref<20xf32, #tpu.memory_space<smem>>
    %301 = vector.broadcast %300 : f32 to vector<33x128xf32>
    %302 = arith.mulf %301, %288 : vector<33x128xf32>
    %303 = arith.addf %285, %302 : vector<33x128xf32>
    %c17_60 = arith.constant 17 : index
    %304 = memref.load %arg6[%c17_60] : memref<20xf32, #tpu.memory_space<smem>>
    %305 = vector.broadcast %304 : f32 to vector<33x128xf32>
    %306 = arith.mulf %305, %291 : vector<33x128xf32>
    %307 = arith.addf %303, %306 : vector<33x128xf32>
    %308 = arith.mulf %288, %129 : vector<33x128xf32>
    %309 = arith.mulf %291, %128 : vector<33x128xf32>
    %310 = arith.addf %308, %309 : vector<33x128xf32>
    %311 = arith.mulf %291, %129 : vector<33x128xf32>
    %312 = arith.mulf %288, %128 : vector<33x128xf32>
    %313 = arith.subf %311, %312 : vector<33x128xf32>
    %c8_61 = arith.constant 8 : index
    %314 = memref.load %arg5[%c8_61] : memref<20xf32, #tpu.memory_space<smem>>
    %315 = vector.broadcast %314 : f32 to vector<33x128xf32>
    %316 = arith.mulf %315, %310 : vector<33x128xf32>
    %317 = arith.addf %299, %316 : vector<33x128xf32>
    %c8_62 = arith.constant 8 : index
    %318 = memref.load %arg6[%c8_62] : memref<20xf32, #tpu.memory_space<smem>>
    %319 = vector.broadcast %318 : f32 to vector<33x128xf32>
    %320 = arith.mulf %319, %313 : vector<33x128xf32>
    %321 = arith.addf %317, %320 : vector<33x128xf32>
    %c18 = arith.constant 18 : index
    %322 = memref.load %arg5[%c18] : memref<20xf32, #tpu.memory_space<smem>>
    %323 = vector.broadcast %322 : f32 to vector<33x128xf32>
    %324 = arith.mulf %323, %310 : vector<33x128xf32>
    %325 = arith.addf %307, %324 : vector<33x128xf32>
    %c18_63 = arith.constant 18 : index
    %326 = memref.load %arg6[%c18_63] : memref<20xf32, #tpu.memory_space<smem>>
    %327 = vector.broadcast %326 : f32 to vector<33x128xf32>
    %328 = arith.mulf %327, %313 : vector<33x128xf32>
    %329 = arith.addf %325, %328 : vector<33x128xf32>
    %330 = arith.mulf %310, %129 : vector<33x128xf32>
    %331 = arith.mulf %313, %128 : vector<33x128xf32>
    %332 = arith.addf %330, %331 : vector<33x128xf32>
    %333 = arith.mulf %313, %129 : vector<33x128xf32>
    %334 = arith.mulf %310, %128 : vector<33x128xf32>
    %335 = arith.subf %333, %334 : vector<33x128xf32>
    %c9_64 = arith.constant 9 : index
    %336 = memref.load %arg5[%c9_64] : memref<20xf32, #tpu.memory_space<smem>>
    %337 = vector.broadcast %336 : f32 to vector<33x128xf32>
    %338 = arith.mulf %337, %332 : vector<33x128xf32>
    %339 = arith.addf %321, %338 : vector<33x128xf32>
    %c9_65 = arith.constant 9 : index
    %340 = memref.load %arg6[%c9_65] : memref<20xf32, #tpu.memory_space<smem>>
    %341 = vector.broadcast %340 : f32 to vector<33x128xf32>
    %342 = arith.mulf %341, %335 : vector<33x128xf32>
    %343 = arith.addf %339, %342 : vector<33x128xf32>
    %c19 = arith.constant 19 : index
    %344 = memref.load %arg5[%c19] : memref<20xf32, #tpu.memory_space<smem>>
    %345 = vector.broadcast %344 : f32 to vector<33x128xf32>
    %346 = arith.mulf %345, %332 : vector<33x128xf32>
    %347 = arith.addf %329, %346 : vector<33x128xf32>
    %c19_66 = arith.constant 19 : index
    %348 = memref.load %arg6[%c19_66] : memref<20xf32, #tpu.memory_space<smem>>
    %349 = vector.broadcast %348 : f32 to vector<33x128xf32>
    %350 = arith.mulf %349, %335 : vector<33x128xf32>
    %351 = arith.addf %347, %350 : vector<33x128xf32>
    %352 = vector.broadcast %110 : vector<1x128xf32> to vector<33x128xf32>
    %353 = arith.mulf %352, %343 : vector<33x128xf32>
    %c0_67 = arith.constant 0 : index
    %c0_68 = arith.constant 0 : index
    %c0_69 = arith.constant 0 : index
    %354 = arith.index_cast %7 : i32 to index
    %355 = vector.load %arg9[%c0_67, %c0_68, %c0_69, %354] : memref<1x2x33x128xf32, #tpu.memory_space<vmem>>, vector<1x1x33x128xf32>
    %356 = vector.shape_cast %355 : vector<1x1x33x128xf32> to vector<33x128xf32>
    %357 = vector.shape_cast %353 : vector<33x128xf32> to vector<1x1x33x128xf32>
    tpu.vector_store %arg9[%c0_67, %c0_68, %c0_69, %354], %357 {strides = array<i32>} : memref<1x2x33x128xf32, #tpu.memory_space<vmem>>, vector<1x1x33x128xf32>,
    %358 = vector.broadcast %110 : vector<1x128xf32> to vector<33x128xf32>
    %359 = arith.mulf %358, %351 : vector<33x128xf32>
    %c0_70 = arith.constant 0 : index
    %c1_71 = arith.constant 1 : index
    %c0_72 = arith.constant 0 : index
    %360 = arith.index_cast %7 : i32 to index
    %361 = vector.load %arg9[%c0_70, %c1_71, %c0_72, %360] : memref<1x2x33x128xf32, #tpu.memory_space<vmem>>, vector<1x1x33x128xf32>
    %362 = vector.shape_cast %361 : vector<1x1x33x128xf32> to vector<33x128xf32>
    %363 = vector.shape_cast %359 : vector<33x128xf32> to vector<1x1x33x128xf32>
    tpu.vector_store %arg9[%c0_70, %c1_71, %c0_72, %360], %363 {strides = array<i32>} : memref<1x2x33x128xf32, #tpu.memory_space<vmem>>, vector<1x1x33x128xf32>,
    %c1_i32_73 = arith.constant 1 : i32
    return
  }
  func.func @transform_0(%arg0: i32, %arg1: i32) -> i32 {
    %c0_i32 = arith.constant 0 : i32
    %c0_i32_0 = arith.constant 0 : i32
    return %c0_i32 : i32
  }
  func.func @transform_1(%arg0: i32, %arg1: i32) -> i32 {
    %c0_i32 = arith.constant 0 : i32
    %c0_i32_0 = arith.constant 0 : i32
    return %c0_i32 : i32
  }
  func.func @transform_2(%arg0: i32, %arg1: i32) -> i32 {
    %c0_i32 = arith.constant 0 : i32
    %c0_i32_0 = arith.constant 0 : i32
    return %c0_i32 : i32
  }
  func.func @transform_3(%arg0: i32, %arg1: i32) -> i32 {
    %c0_i32 = arith.constant 0 : i32
    %c0_i32_0 = arith.constant 0 : i32
    return %c0_i32 : i32
  }
  func.func @transform_4(%arg0: i32, %arg1: i32) -> i32 {
    %c0_i32 = arith.constant 0 : i32
    %c0_i32_0 = arith.constant 0 : i32
    return %c0_i32 : i32
  }
  func.func @transform_5(%arg0: i32, %arg1: i32) -> (i32, i32, i32) {
    %c0_i32 = arith.constant 0 : i32
    %c0_i32_0 = arith.constant 0 : i32
    return %arg0, %c0_i32, %arg1 : i32, i32, i32
  }
  func.func @transform_6(%arg0: i32, %arg1: i32) -> (i32, i32, i32) {
    %c0_i32 = arith.constant 0 : i32
    %c0_i32_0 = arith.constant 0 : i32
    return %arg0, %c0_i32, %arg1 : i32, i32, i32
  }
  func.func @transform_7(%arg0: i32, %arg1: i32) -> (i32, i32, i32, i32) {
    %c0_i32 = arith.constant 0 : i32
    %c0_i32_0 = arith.constant 0 : i32
    %c0_i32_1 = arith.constant 0 : i32
    return %arg0, %c0_i32, %c0_i32_0, %arg1 : i32, i32, i32, i32
  }
}

</mosaic_0001>

<bundles_post_ra>
// kernel: tpu_custom_call.1
= control target key start
LH: loop header
LB: loop body
LE: loop exit
PB: predicated region body
PF: predicated region fallthrough
CT: control target
= control target key end

     0   :  { %12 = vsyncpa [#allocation3], 0  ;;  %s4626_s0 = inlined_call_operand.vmem [shape: f32[18], index: 0, kind: input, shape index: {}]   ;;  %s4627_s1 = inlined_call_operand.vmem [shape: f32[3], index: 1, kind: input, shape index: {}]   ;;  %s4628_s2 = inlined_call_operand.vmem [shape: f32[2], index: 2, kind: input, shape index: {}]   ;;  %s4629_s3 = inlined_call_operand.vmem [shape: f32[20], index: 3, kind: input, shape index: {}]   ;;  %s4630_s4 = inlined_call_operand.vmem [shape: f32[20], index: 4, kind: input, shape index: {}]   ;;  %s4631_s5 = inlined_call_operand.vmem [shape: f32[2,3,16], index: 5, kind: input, shape index: {}]   ;;  %s4632_s6 = inlined_call_operand.vmem [shape: f32[2,3,16], index: 6, kind: input, shape index: {}]   ;;  %s4633_s7 = inlined_call_operand.vmem [shape: f32[2,2,33,16], index: 7, kind: output, shape index: {}]  }
   0x1   :  { %13 = vsyncpa [#allocation5], 0 }
   0x2   :  { %14 = vsyncpa [#allocation8], 0  ;;  %s2895_s24 = smov 0   ;;  %s2897_s25 = smov 0  }
   0x3   :  { %s2899_s26 = smov 0  }
   0x4 LB: > { %s250_s29 = sshll.u32 %s4627_s1, 4  ;;  %s2487_s30 = sadd.s32 4294967295, %s2842_s26   ;;  %s2842_s26 = sphi %s2899_s26, %s20_s26   ;;  %s2838_s25 = sphi %s2897_s25, %s4656_s25   ;;  %s2834_s24 = sphi %s2895_s24, %s4655_s24   ;;  %s251_s29 = int_to_ptr.vmem [resolvable:$true] %s250_s29 }
   0x5   : > { %p2489_p0 = scmp.ge.s32.totalorder %s2842_s26, 1  ;;  %p226_p1 = scmp.lt.s32.totalorder %s2842_s26, 3 }
   0x6   : > { %p2916_p2 = scmp.eq.s32.totalorder %s2487_s30, 0  ;;  %s272_s12 = sshll.u32 %s4629_s3, 4  ;;  %s273_s12 = int_to_ptr.vmem [resolvable:$true] %s272_s12 }
   0x7   : > { %p2920_p3 = pnand %p2489_p0, %p226_p1  ;;  %s32_s14 = sadd.s32 1, %s2838_s25 }
   0x8   : > { %s4637_s8 = scalar_select %p2916_p2, 1, 0 }
   0x9   : > { %s4638_s9 = scalar_select %p2920_p3, 1, 0 }
   0xa   : > { %p2652_p4 = pneg %p2920_p3  ;;  %s239_s17 = sshll.u32 %s4626_s0, 4  ;;  %s240_s17 = int_to_ptr.vmem [resolvable:$true] %s239_s17 }
   0xb   : > { %p2939_p6 = scmp.ge.s32.totalorder %s32_s14, 2  ;;  %s2733_s19 = scalar_lea.vmem %s251_s29, 16 }
   0xc   : > { %p2931_p5 = pnand %p2916_p2, %p2652_p4  ;;  %p2734_p7 = scmp.ne.s32.totalorder %s251_s29, %s2733_s19 }
   0xd   : > { %s4640_s18 = scalar_select %p2939_p6, 1, 0 }
   0xe   : > { %p2945_p8 = pneg %p2931_p5  ;;  %p2741_p11 = scmp.lt.s32.totalorder %s251_s29, %s251_s29 }
   0xf   : > { %p2742_p12 = scmp.lt.s32.totalorder %s2733_s19, %s2733_s19 }
  0x10   : > { %p2736_p9 = pnand %p2945_p8, %p2734_p7 }
  0x11   : > { %p2743_p13 = por %p2742_p12, %p2741_p11 }
  0x12   : > { %p2737_p10 = pneg %p2736_p9 }
  0x14   : > { %p2744_p0 = pnand %p2743_p13, %p2737_p10 }
  0x16   : > { %2747 = shalt.err (!%p2744_p0)
}
  0x17   : > { %s2844_s21 = smov [#allocation4]   ;;  %s2748_s22 = scalar_lea.vmem %s273_s12, 16 }
  0x18   : > { %2658 = dma.vmem_to_smem (!%p2931_p5), %s251_s29, 16, %s2844_s21, [#allocation5]  }
  0x19   : > { %p2749_p1 = scmp.ne.s32.totalorder %s273_s12, %s2748_s22  ;;  %p2756_p3 = scmp.lt.s32.totalorder %s273_s12, %s273_s12 }
  0x1a   : > { %p2757_p6 = scmp.lt.s32.totalorder %s2748_s22, %s2748_s22 }
  0x1b   : > { %p2751_p4 = pnand %p2749_p1, %p2945_p8 }
  0x1c   : > { %p2758_p7 = por %p2757_p6, %p2756_p3 }
  0x1d   : > { %p2752_p2 = pneg %p2751_p4 }
  0x1f   : > { %p2759_p9 = pnand %p2758_p7, %p2752_p2 }
  0x21   : > { %2762 = shalt.err (!%p2759_p9)
}
  0x22   : > { %s2845_s23 = smov [#allocation7]   ;;  %p4642_p10 = scmp.ne.s32.totalorder %s4640_s18, 0 }
  0x23   : > { %2664 = dma.vmem_to_smem (!%p2931_p5), %s273_s12, 16, %s2845_s23, [#allocation8]  }
  0x24   : > { %s4658_s14 = smov (%p4642_p10, %s32_s14), 0  ;;  %s2763_s27 = scalar_lea.vmem %s240_s17, 16 }
  0x25   : > { %p2764_p11 = scmp.ne.s32.totalorder %s240_s17, %s2763_s27  ;;  %p2771_p0 = scmp.lt.s32.totalorder %s240_s17, %s240_s17 }
  0x26   : > { %p2772_p1 = scmp.lt.s32.totalorder %s2763_s27, %s2763_s27 }
  0x27   : > { %p2766_p12 = pnand %p2764_p11, %p2945_p8 }
  0x28   : > { %p2773_p3 = por %p2772_p1, %p2771_p0 }
  0x29   : > { %p2767_p13 = pneg %p2766_p12 }
  0x2b   : > { %p2774_p2 = pnand %p2773_p3, %p2767_p13 }
  0x2d   : > { %2777 = shalt.err (!%p2774_p2)
}
  0x2e   : > { %s2846_s28 = smov [#allocation2]   ;;  %s261_s10 = sshll.u32 %s4628_s2, 4  ;;  %s262_s10 = int_to_ptr.vmem [resolvable:$true] %s261_s10 }
  0x2f   : > { %2655 = dma.vmem_to_smem (!%p2931_p5), %s240_s17, 16, %s2846_s28, [#allocation3]  }
  0x30   : > { %s283_s15 = sshll.u32 %s4630_s4, 4  ;;  %s2778_s16 = scalar_lea.vmem %s262_s10, 16  ;;  %s284_s15 = int_to_ptr.vmem [resolvable:$true] %s283_s15 }
  0x31   : > { %p2779_p6 = scmp.ne.s32.totalorder %s262_s10, %s2778_s16  ;;  %p2786_p9 = scmp.lt.s32.totalorder %s262_s10, %s262_s10 }
  0x32   : > { %p2787_p10 = scmp.lt.s32.totalorder %s2778_s16, %s2778_s16 }
  0x33   : > { %p2781_p4 = pnand %p2779_p6, %p2945_p8 }
  0x34   : > { %p2788_p11 = por %p2787_p10, %p2786_p9 }
  0x35   : > { %p2782_p7 = pneg %p2781_p4 }
  0x37   : > { %p2789_p12 = pnand %p2788_p11, %p2782_p7 }
  0x39   : > { %2792 = shalt.err (!%p2789_p12)
}
  0x3a   : > { %s2847_s17 = smov [#allocation6]   ;;  %s2793_s18 = scalar_lea.vmem %s284_s15, 16 }
  0x3b   : > { %2661 = dma.vmem_to_smem (!%p2931_p5), %s262_s10, 16, %s2847_s17, [#allocation5]  }
  0x3c   : > { %p2794_p13 = scmp.ne.s32.totalorder %s284_s15, %s2793_s18  ;;  %p2801_p3 = scmp.lt.s32.totalorder %s284_s15, %s284_s15 }
  0x3d   : > { %p2802_p2 = scmp.lt.s32.totalorder %s2793_s18, %s2793_s18 }
  0x3e   : > { %p2796_p0 = pnand %p2794_p13, %p2945_p8 }
  0x3f   : > { %p2803_p6 = por %p2802_p2, %p2801_p3 }
  0x40   : > { %p2797_p1 = pneg %p2796_p0 }
  0x42   : > { %p2804_p4 = pnand %p2803_p6, %p2797_p1 }
  0x44   : > { %2807 = shalt.err (!%p2804_p4)
}
  0x45   : > { %s2848_s19 = smov [#allocation9]   ;;  %p4643_p7 = scmp.ne.s32.totalorder %s4638_s9, 0 }
  0x46   : > { %2667 = dma.vmem_to_smem (!%p2931_p5), %s284_s15, 16, %s2848_s19, [#allocation8]  }
  0x47   : > { %316 = sbr.rel (%p4643_p7) target bundleno = 455 (0x1c7), region = 48  ;;  %p4644_p9 = scmp.ne.s32.totalorder (!%p4643_p7), %s4637_s8, 0 }
  0x4c   : > { %2821 = dma.done.wait (%p4644_p9), [#allocation3], 16  }
  0x4d   : > { %2823 = vsyncadd (%p4644_p9), [#allocation3], 4294967280 }
  0x4e   : > { %2825 = dma.done.wait (%p4644_p9), [#allocation5], 32  }
  0x4f   : > { %2827 = vsyncadd (%p4644_p9), [#allocation5], 4294967264 }
  0x50   : > { %2829 = dma.done.wait (%p4644_p9), [#allocation8], 32  }
  0x51   : > { %2831 = vsyncadd (%p4644_p9), [#allocation8], 4294967264 }
  0x52   : > { %338 = sfence }
  0x53   : > { %p377_p5 = scmp.lt.s32.totalorder %s2834_s24, 1  ;;  %s421_s9 = sld [smem:[#allocation4]]  ;;  %v399_v56 = vlaneseq }
  0x54   : > { %s424_s13 = sld [smem:[#allocation2]] }
  0x55   : > { %s4660_s24 = smov (!%p377_p5, %s2834_s24), 1  ;;  %s2505_s20 = sld [smem:[#allocation2 + $0x1]]  ;;  %v400_v62 = vshrl.u32 %v399_v56, 7 }
  0x56   : > { %s2502_s21 = sshll.u32 %s4660_s24, 2  ;;  %s2506_s30 = sld [smem:[#allocation2 + $0x2]] }
  0x57   : > { %s383_s27 = scalar_lea.vmem %s4631_s5, %s2502_s21  ;;  %s390_s8 = scalar_lea.vmem %s4632_s6, %s2502_s21 }
  0x58   : > { %v415_v0 = vld [vmem:[%s383_s27] sm:$0x1]  ;;  %s2507_s10 = sld [smem:[#allocation2 + $0x3]]  ;;  %v416_v9 = vld [vmem:[%s383_s27 + $0x1] sm:$0x1] }
  0x59   : > { %v422_v1 = vstv %s421_s9  ;;  %v418_v3 = vld [vmem:[%s390_s8] sm:$0x1]  ;;  %s2508_s11 = sld [smem:[#allocation2 + $0x4]]  ;;  %v419_v11 = vld [vmem:[%s390_s8 + $0x1] sm:$0x1] }
  0x5a   : > { %v425_v2 = vstv %s424_s13  ;;  %s2509_s12 = sld [smem:[#allocation2 + $0x5]]  ;;  %v417_v14 = vld [vmem:[%s383_s27 + $0x2] sm:$0x1] }
  0x5b   : > { %v426_v4 = vmul.f32 %v425_v2, %v415_v0  ;;  %v429_v5 = vstv %s2505_s20  ;;  %s2510_s15 = sld [smem:[#allocation4 + $0x1]]  ;;  %v420_v20 = vld [vmem:[%s390_s8 + $0x2] sm:$0x1]  ;;  %v401_v2 = vadd.s32 8, %v400_v62 }
  0x5c   : > { %v430_v6 = vmul.f32 %v429_v5, %v418_v3  ;;  %s2511_s16 = sld [smem:[#allocation2 + $0x6]]  ;;  %v433_v10 = vstv %s2506_s30 }
  0x5d   : > { %v427_v7 = vadd.f32 %v426_v4, %v422_v1  ;;  %s2512_s17 = sld [smem:[#allocation2 + $0x7]]  ;;  %v434_v12 = vmul.f32 %v433_v10, %v416_v9 }
  0x5e   : > { %v437_v13 = vstv %s2507_s10  ;;  %s2513_s18 = sld [smem:[#allocation2 + $0x8]] }
  0x5f   : > { %v431_v8 = vadd.f32 %v430_v6, %v427_v7  ;;  %v438_v15 = vmul.f32 %v437_v13, %v419_v11  ;;  %v441_v16 = vstv %s2508_s11  ;;  %s2514_s19 = sld [smem:[#allocation2 + $0x9]]  ;;  %v3009_v7 = vsub.s32 0, %v400_v62 }
  0x60   : > { %v442_v18 = vmul.f32 %v441_v16, %v417_v14  ;;  %v445_v19 = vstv %s2509_s12  ;;  %s3004_s9 = sld [smem:[#allocation2 + $0xa]] }
  0x61   : > { %v435_v17 = vadd.f32 %v434_v12, %v431_v8  ;;  %v446_v22 = vmul.f32 %v445_v19, %v420_v20  ;;  %v449_v23 = vstv %s2510_s15  ;;  %s2517_s13 = sld [smem:[#allocation4 + $0x2]]  ;;  %v405_v8 = vcvt.s32.f32 %v400_v62 }
  0x62   : > { %v452_v24 = vstv %s2511_s16  ;;  %s2518_s20 = sld [smem:[#allocation2 + $0xc]] }
  0x63   : > { %v439_v21 = vadd.f32 %v438_v15, %v435_v17  ;;  %v453_v25 = vmul.f32 %v452_v24, %v415_v0  ;;  %v456_v26 = vstv %s2512_s17  ;;  %s2519_s21 = sld [smem:[#allocation2 + $0xd]]  ;;  %v404_v24 = vadd.s32 32, %v400_v62 }
  0x64   : > { %v457_v28 = vmul.f32 %v456_v26, %v418_v3  ;;  %v460_v30 = vstv %s2513_s18  ;;  %s2520_s22 = sld [smem:[#allocation2 + $0xe]] }
  0x65   : > { %v443_v27 = vadd.f32 %v442_v18, %v439_v21  ;;  %v454_v29 = vadd.f32 %v453_v25, %v449_v23  ;;  %s2521_s23 = sld [smem:[#allocation2 + $0xf]]  ;;  %v461_v33 = vmul.f32 %v460_v30, %v416_v9  ;;  %v464_v34 = vstv %s2514_s19 }
  0x66   : > { %s2522_s27 = sld [smem:[#allocation2 + $0x10]]  ;;  %v465_v39 = vmul.f32 %v464_v34, %v419_v11  ;;  %v468_v46 = vstv %s3004_s9  ;;  %v403_v23 = vadd.s32 24, %v400_v62 }
  0x67   : > { %v3006_v31 = vadd.f32 %v446_v22, %v443_v27  ;;  %v458_v32 = vadd.f32 %v457_v28, %v454_v29  ;;  %s2523_s28 = sld [smem:[#allocation2 + $0x11]]  ;;  %v476_v35 = vstv %s2517_s13  ;;  %v469_v52 = vmul.f32 %v468_v46, %v417_v14 }
  0x68   : > { %s2516_s29 = sld [smem:[#allocation2 + $0xb]]  ;;  %v479_v36 = vstv %s2518_s20  ;;  %v408_v34 = vcvt.s32.f32 %v403_v23 }
  0x69   : > { %v480_v37 = vmul.f32 %v479_v36, %v415_v0  ;;  %v483_v38 = vstv %s2519_s21  ;;  %v462_v42 = vadd.f32 %v461_v33, %v458_v32  ;;  %s3471_s8 = sld [smem:[#allocation7]] }
  0x6a   : > { %v484_v40 = vmul.f32 %v483_v38, %v418_v3  ;;  %v487_v41 = vstv %s2520_s22  ;;  %v402_v3 = vadd.s32 16, %v400_v62  ;;  %s3481_s30 = sld [smem:[#allocation6]] }
  0x6b   : > { %v481_v43 = vadd.f32 %v480_v37, %v476_v35  ;;  %v488_v44 = vmul.f32 %v487_v41, %v416_v9  ;;  %v491_v45 = vstv %s2521_s23  ;;  %v466_v51 = vadd.f32 %v465_v39, %v462_v42  ;;  %s3485_s10 = sld [smem:[#allocation9]] }
  0x6c   : > { %v495_v47 = vstv %s2522_s27  ;;  %v492_v49 = vmul.f32 %v491_v45, %v419_v11  ;;  %v406_v9 = vcvt.s32.f32 %v401_v2  ;;  %v407_v10 = vcvt.s32.f32 %v402_v3  ;;  %s3497_s11 = sld [smem:[#allocation7 + $0xa]] }
  0x6d   : > { %v485_v48 = vadd.f32 %v484_v40, %v481_v43  ;;  %v499_v50 = vstv %s2523_s28  ;;  %v496_v54 = vmul.f32 %v495_v47, %v417_v14  ;;  %v470_v59 = vadd.f32 %v469_v52, %v466_v51  ;;  %s3523_s12 = sld [smem:[#allocation6 + $0x1]] }
  0x6e   : > { %v472_v55 = vstv %s2516_s29  ;;  %v500_v58 = vmul.f32 %v499_v50, %v420_v20  ;;  %v409_v35 = vcvt.s32.f32 %v404_v24  ;;  %s3560_s15 = sld [smem:[#allocation9 + $0xa]] }
  0x6f   : > { %v489_v53 = vadd.f32 %v488_v44, %v485_v48  ;;  %v473_v60 = vmul.f32 %v472_v55, %v420_v20  ;;  %v2849_v55 = vmov 683565275   ;;  %s3608_s16 = sld [smem:[#allocation7 + $0x1]] }
  0x70   : > { %s3664_s17 = sld [smem:[#allocation9 + $0x1]] }
  0x71   : > { %v493_v57 = vadd.f32 %v492_v49, %v489_v53  ;;  %v474_v0 = vadd.f32 %v473_v60, %v470_v59  ;;  %v2851_v59 = vmov 2131351028   ;;  %s3670_s18 = sld [smem:[#allocation7 + $0xb]] }
  0x72   : > { %s3708_s19 = sld [smem:[#allocation9 + $0xb]] }
  0x73   : > { %v497_v61 = vadd.f32 %v496_v54, %v493_v57  ;;  %v2524_v5 = vclamps-f32 %v474_v0, 7.0  ;;  %v2850_v57 = vmov 2475754826   ;;  %s3747_s9 = sld [smem:[#allocation7 + $0x2]] }
  0x74   : > { %s3754_s13 = sld [smem:[#allocation9 + $0x2]] }
  0x75   : > { %v501_v63 = vadd.f32 %v500_v58, %v497_v61  ;;  %v2852_v61 = vmov 2102212464   ;;  %s3795_s20 = sld [smem:[#allocation7 + $0xc]] }
  0x76   : > { %s3841_s21 = sld [smem:[#allocation9 + $0xc]] }
  0x77   : > { %v505_v1 = vadd.f32 1.0, %v501_v63  ;;  %v2853_v63 = vmov 920167782   ;;  %s3935_s22 = sld [smem:[#allocation7 + $0x3]] }
  0x78   : > { %s3941_s23 = sld [smem:[#allocation7 + $0xd]] }
  0x79   : > { %v506_v4 = vmax.f32 %v505_v1, 0.5  ;;  %s3947_s27 = sld [smem:[#allocation9 + $0x3]] }
  0x7a   : > { %s3991_s28 = sld [smem:[#allocation9 + $0xd]] }
  0x7b   : > { %v507_v6 = vmin.f32 %v506_v4, 1.28  ;;  %s4028_s29 = sld [smem:[#allocation7 + $0x4]] }
  0x7d   : > { %v508_v11 = vmul.f32 0.13659099, %v507_v6 }
  0x7f   : > { %v509_v12 = vmul.f32 %v2524_v5, %v508_v11  ;;  %v513_v13 = vrot.slane %v508_v11, %v3009_v7 }
  0x81   : > { %v514_v14 = vmul.f32 %v513_v13, %v405_v8  ;;  %v515_v15 = vmul.f32 %v513_v13, %v406_v9  ;;  %v516_v16 = vmul.f32 %v513_v13, %v407_v10  ;;  %v3013_v17 = vrot.slane %v509_v12, %v3009_v7 }
  0x82   : > { %v3033_v43 = vmul.f32 %v513_v13, %v408_v34  ;;  %v3035_v44 = vmul.f32 %v513_v13, %v409_v35  ;;  %v2854_v8 = vmov 1326507024  }
  0x83   : > { %v3016_v18 = vsub.f32 %v514_v14, %v3013_v17  ;;  %v3019_v19 = vsub.f32 %v515_v15, %v3013_v17  ;;  %v3022_v20 = vsub.f32 %v516_v16, %v3013_v17 }
  0x85   : > { %v528_v21 = vand.u32 2147483647, %v3016_v18  ;;  %v531_v22 = vand.u32 2139095040, %v3016_v18  ;;  %v632_v25 = vand.u32 2147483647, %v3019_v19  ;;  %v635_v26 = vand.u32 2139095040, %v3019_v19 }
  0x86   : > { %v739_v32 = vand.u32 2139095040, %v3022_v20  ;;  %v736_v49 = vand.u32 2147483647, %v3022_v20  ;;  %vm530_vm14 = vcmp.lt.s32.totalorder %v3016_v18, 0 }
  0x87   : > { %v532_v27 = vshrl.u32 %v531_v22, 23  ;;  %v535_v28 = vand.u32 8388607, %v528_v21  ;;  %v636_v29 = vshrl.u32 %v635_v26, 23  ;;  %v639_v30 = vand.u32 8388607, %v632_v25 }
  0x88   : > { %v740_v37 = vshrl.u32 %v739_v32, 23 }
  0x89   : > { %v2525_v33 = vadd.s32 4294967169, %v532_v27  ;;  %v2529_v36 = vadd.s32 4294967169, %v636_v29  ;;  %v536_v39 = vor.u32 8388608, %v535_v28  ;;  %v640_v40 = vor.u32 8388608, %v639_v30 }
  0x8a   : > { %v2533_v42 = vadd.s32 4294967169, %v740_v37 }
  0x8b   : > { %v538_v38 = vadd.s32 1, %v2525_v33  ;;  %v642_v41 = vadd.s32 1, %v2529_v36  ;;  %v3038_v50 = vshll.u32 %v536_v39, 8  ;;  %v3040_v52 = vshll.u32 %v640_v40, 8 }
  0x8c   : > { %v3042_v53 = vadd.s32 1, %v2533_v42 }
  0x8d   : > { %vm539_vm0 = vcmp.gt.s32.totalorder %v538_v38, 0  ;;  %vm643_vm1 = vcmp.gt.s32.totalorder %v642_v41, 0 }
  0x8e   : > { %v540_v45 = vsel %vm539_vm0, %v538_v38, 0  ;;  %v644_v48 = vsel %vm643_vm1, %v642_v41, 0  ;;  %vm747_vm6 = vcmp.gt.s32.totalorder %v3042_v53, 0 }
  0x8f   : > { %v541_v46 = vshrl.u32 %v540_v45, 5  ;;  %v542_v47 = vand.u32 31, %v540_v45  ;;  %v646_v51 = vand.u32 31, %v644_v48  ;;  %v3049_v1 = vshrl.u32 %v644_v48, 5 }
  0x91   : > { %v543_v54 = vsub.s32 32, %v542_v47  ;;  %v545_v56 = vshll.u32 %v2849_v55, %v542_v47  ;;  %v548_v58 = vshll.u32 %v2850_v57, %v542_v47  ;;  %v551_v60 = vshll.u32 %v2851_v59, %v542_v47 }
  0x92   : > { %v554_v62 = vshll.u32 %v2852_v61, %v542_v47  ;;  %v557_v0 = vshll.u32 %v2853_v63, %v542_v47  ;;  %vm560_vm2 = vcmp.lt.s32.totalorder %v541_v46, 1  ;;  %vm561_vm3 = vcmp.lt.s32.totalorder %v541_v46, 2 }
  0x93   : > { %v544_v2 = vshrl.u32 %v2849_v55, %v543_v54  ;;  %v546_v3 = vshrl.u32 %v2850_v57, %v543_v54  ;;  %v549_v4 = vshrl.u32 %v2851_v59, %v543_v54  ;;  %v552_v5 = vshrl.u32 %v2852_v61, %v543_v54 }
  0x94   : > { %v555_v6 = vshrl.u32 %v2853_v63, %v543_v54  ;;  %v558_v9 = vshrl.u32 %v2854_v8, %v543_v54  ;;  %vm563_vm4 = vcmp.lt.s32.totalorder %v541_v46, 4  ;;  %v647_v13 = vsub.s32 32, %v646_v51 }
  0x95   : > { %v547_v10 = vor.u32 %v546_v3, %v545_v56  ;;  %v550_v11 = vor.u32 %v549_v4, %v548_v58  ;;  %v553_v12 = vor.u32 %v552_v5, %v551_v60  ;;  %vm562_vm5 = vcmp.lt.s32.totalorder %v541_v46, 3 }
  0x96   : > { %v556_v14 = vor.u32 %v555_v6, %v554_v62  ;;  %v559_v15 = vor.u32 %v558_v9, %v557_v0  ;;  %v649_v16 = vshll.u32 %v2849_v55, %v646_v51  ;;  %v652_v30 = vshll.u32 %v2850_v57, %v646_v51 }
  0x97   : > { %v564_v22 = vsel %vm560_vm2, %v544_v2, %v547_v10  ;;  %v565_v23 = vsel %vm563_vm4, %v553_v12, 2102212464  ;;  %v568_v24 = vsel %vm560_vm2, %v547_v10, %v550_v11  ;;  %v572_v26 = vsel %vm560_vm2, %v550_v11, %v553_v12 }
  0x98   : > { %v566_v27 = vsel %vm562_vm5, %v550_v11, %v565_v23  ;;  %v569_v28 = vsel %vm563_vm4, %v556_v14, 920167782  ;;  %v573_v29 = vsel %vm563_vm4, %v559_v15, 1326507024  ;;  %v648_v34 = vshrl.u32 %v2849_v55, %v647_v13 }
  0x99   : > { %v570_v32 = vsel %vm562_vm5, %v553_v12, %v569_v28  ;;  %v574_v33 = vsel %vm562_vm5, %v556_v14, %v573_v29  ;;  %v650_v35 = vshrl.u32 %v2850_v57, %v647_v13  ;;  %v567_v36 = vsel %vm561_vm3, %v564_v22, %v566_v27 }
  0x9a   : > { %v571_v37 = vsel %vm561_vm3, %v568_v24, %v570_v32  ;;  %v575_v38 = vsel %vm561_vm3, %v572_v26, %v574_v33  ;;  %v653_v39 = vshrl.u32 %v2851_v59, %v647_v13  ;;  %v655_v54 = vshll.u32 %v2851_v59, %v646_v51 }
  0x9b   : > { %v3070_v40 = vmul.u32.u64.low %v3038_v50, %v575_v38  ;;  %v3071_v41 = vmul.u32.u64.high %v3038_v50, %v575_v38, %v3070_v40  ;;  %v3074_v42 = vmul.u32.u64.low %v3038_v50, %v571_v37  ;;  %v3075_v45 = vmul.u32.u64.high %v3038_v50, %v571_v37, %v3074_v42 }
  0x9c   : > { %v651_v47 = vor.u32 %v650_v35, %v649_v16  ;;  %v654_v48 = vor.u32 %v653_v39, %v652_v30  ;;  %v656_v56 = vshrl.u32 %v2852_v61, %v647_v13  ;;  %v658_v46 = vshll.u32 %v2852_v61, %v646_v51 }
  0x9d   : > { %v659_v58 = vshrl.u32 %v2853_v63, %v647_v13  ;;  %v661_v60 = vshll.u32 %v2853_v63, %v646_v51  ;;  %v662_v62 = vshrl.u32 %v2854_v8, %v647_v13  ;;  %v583_v0 = vmul.u32 %v3038_v50, %v567_v36 }
  0x9e   : > { %v657_v2 = vor.u32 %v656_v56, %v655_v54  ;;  %vm664_vm7 = vcmp.lt.s32.totalorder %v3049_v1, 1  ;;  %vm665_vm8 = vcmp.lt.s32.totalorder %v3049_v1, 2  ;;  %vm585_vm9 = vc.u32 %v3071_v41, %v3074_v42 }
  0x9f   : > { %v586_v3 = vadd.s32 1, %v3075_v45  ;;  %v660_v4 = vor.u32 %v659_v58, %v658_v46  ;;  %vm666_vm10 = vcmp.lt.s32.totalorder %v3049_v1, 3  ;;  %v663_v5 = vor.u32 %v662_v62, %v661_v60 }
  0xa0   : > { %vm667_vm11 = vcmp.lt.s32.totalorder %v3049_v1, 4  ;;  %v668_v51 = vsel %vm664_vm7, %v648_v34, %v651_v47  ;;  %v672_v6 = vsel %vm664_vm7, %v651_v47, %v654_v48  ;;  %v676_v11 = vsel %vm664_vm7, %v654_v48, %v657_v2 }
  0xa1   : > { %v587_v50 = vsel %vm585_vm9, %v586_v3, %v3075_v45  ;;  %v669_v9 = vsel %vm667_vm11, %v657_v2, 2102212464  ;;  %v673_v10 = vsel %vm667_vm11, %v660_v4, 920167782  ;;  %v677_v15 = vsel %vm667_vm11, %v663_v5, 1326507024 }
  0xa2   : > { %v588_v12 = vadd.s32 %v587_v50, %v583_v0  ;;  %v670_v13 = vsel %vm666_vm10, %v654_v48, %v669_v9  ;;  %v674_v14 = vsel %vm666_vm10, %v657_v2, %v673_v10  ;;  %v678_v23 = vsel %vm666_vm10, %v660_v4, %v677_v15 }
  0xa3   : > { %v671_v16 = vsel %vm665_vm8, %v668_v51, %v670_v13  ;;  %v675_v22 = vsel %vm665_vm8, %v672_v6, %v674_v14  ;;  %v748_v24 = vsel %vm747_vm6, %v3042_v53, 0  ;;  %v679_v27 = vsel %vm665_vm8, %v676_v11, %v678_v23 }
  0xa4   : > { %v589_v26 = vadd.s32 536870912, %v588_v12  ;;  %v3103_v28 = vmul.u32.u64.low %v3040_v52, %v675_v22  ;;  %v3104_v29 = vmul.u32.u64.high %v3040_v52, %v675_v22, %v3103_v28  ;;  %v3109_v30 = vsub.f32 %v3033_v43, %v3013_v17 }
  0xa5   : > { %v3112_v32 = vmul.u32.u64.low %v3040_v52, %v679_v27  ;;  %v3113_v33 = vmul.u32.u64.high %v3040_v52, %v679_v27, %v3112_v32  ;;  %v743_v53 = vand.u32 8388607, %v736_v49  ;;  %v750_v1 = vand.u32 31, %v748_v24 }
  0xa6   : > { %v3117_v34 = vshrl.u32 %v589_v26, 30  ;;  %v687_v35 = vmul.u32 %v3040_v52, %v671_v16  ;;  %v690_v37 = vadd.s32 1, %v3104_v29  ;;  %v3124_v43 = vsub.f32 %v3035_v44, %v3013_v17 }
  0xa7   : > { %v751_v38 = vsub.s32 32, %v750_v1  ;;  %vm689_vm12 = vc.u32 %v3113_v33, %v3103_v28  ;;  %v744_v39 = vor.u32 8388608, %v743_v53  ;;  %v843_v40 = vand.u32 2139095040, %v3109_v30 }
  0xa8   : > { %v591_v36 = vshll.u32 %v3117_v34, 30  ;;  %v691_v47 = vsel %vm689_vm12, %v690_v37, %v3104_v29  ;;  %v3132_v52 = vshrl.u32 %v748_v24, 5  ;;  %v840_v48 = vand.u32 2147483647, %v3109_v30 }
  0xa9   : > { %v692_v54 = vadd.s32 %v691_v47, %v687_v35  ;;  %v753_v56 = vshll.u32 %v2849_v55, %v750_v1  ;;  %v754_v17 = vshrl.u32 %v2850_v57, %v751_v38  ;;  %v756_v44 = vshll.u32 %v2850_v57, %v750_v1 }
  0xaa   : > { %v3129_v45 = vsub.s32 %v588_v12, %v591_v36  ;;  %v757_v58 = vshrl.u32 %v2851_v59, %v751_v38  ;;  %v759_v60 = vshll.u32 %v2851_v59, %v750_v1  ;;  %v760_v62 = vshrl.u32 %v2852_v61, %v751_v38 }
  0xab   : > { %v693_v0 = vadd.s32 536870912, %v692_v54  ;;  %v762_v2 = vshll.u32 %v2852_v61, %v750_v1  ;;  %v3143_v3 = vshll.u32 %v744_v39, 8  ;;  %v844_v4 = vshrl.u32 %v843_v40, 23 }
  0xac   : > { %v594_v46 = vsub.s32 0, %v3129_v45  ;;  %v584_v5 = vadd.s32 %v3074_v42, %v3071_v41  ;;  %v763_v6 = vshrl.u32 %v2853_v63, %v751_v38  ;;  %vm771_vm13 = vcmp.lt.s32.totalorder %v3132_v52, 4 }
  0xad   : > { %v3150_v50 = vshrl.u32 %v693_v0, 30  ;;  %v752_v9 = vshrl.u32 %v2849_v55, %v751_v38  ;;  %v765_v10 = vshll.u32 %v2853_v63, %v750_v1  ;;  %v766_v11 = vshrl.u32 %v2854_v8, %v751_v38 }
  0xae   : > { %v2526_v51 = vmin.u32 %v594_v46, %v3129_v45  ;;  %v755_v13 = vor.u32 %v754_v17, %v753_v56  ;;  %v758_v14 = vor.u32 %v757_v58, %v756_v44  ;;  %v761_v41 = vor.u32 %v760_v62, %v759_v60 }
  0xaf   : > { %v695_v42 = vshll.u32 %v3150_v50, 30  ;;  %v764_v15 = vor.u32 %v763_v6, %v762_v2  ;;  %vm768_vm15 = vcmp.lt.s32.totalorder %v3132_v52, 1  ;;  %vm770_vm0 = vcmp.lt.s32.totalorder %v3132_v52, 3 }
  0xb0   : > { %v596_v12 = vclz %v2526_v51  ;;  %v767_v22 = vor.u32 %v766_v11, %v765_v10  ;;  %v773_v23 = vsel %vm771_vm13, %v761_v41, 2102212464  ;;  %v2537_v24 = vadd.s32 4294967169, %v844_v4 }
  0xb1   : > { %v614_v26 = vsub.s32 4, %v3117_v34  ;;  %v3162_v27 = vsub.s32 %v692_v54, %v695_v42  ;;  %vm769_vm1 = vcmp.lt.s32.totalorder %v3132_v52, 2  ;;  %v777_v29 = vsel %vm771_vm13, %v764_v15, 920167782 }
  0xb2   : > { %v2527_v16 = vadd.s32 4294967294, %v596_v12  ;;  %v772_v32 = vsel %vm768_vm15, %v752_v9, %v755_v13  ;;  %v776_v53 = vsel %vm768_vm15, %v755_v13, %v758_v14  ;;  %v778_v1 = vsel %vm770_vm0, %v761_v41, %v777_v29 }
  0xb3   : > { %v698_v36 = vsub.s32 0, %v3162_v27  ;;  %v774_v37 = vsel %vm770_vm0, %v758_v14, %v773_v23  ;;  %v780_v38 = vsel %vm768_vm15, %v758_v14, %v761_v41  ;;  %v781_v54 = vsel %vm771_vm13, %v767_v22, 1326507024 }
  0xb4   : > { %vm2528_vm2 = vcmp.lt.s32.totalorder %v2527_v16, 0  ;;  %v779_v17 = vsel %vm769_vm1, %v776_v53, %v778_v1  ;;  %v782_v44 = vsel %vm770_vm0, %v764_v15, %v781_v54  ;;  %v3188_v46 = vand.u32 8388607, %v840_v48 }
  0xb5   : > { %v599_v35 = vsel %vm2528_vm2, 0, %v2527_v16  ;;  %v2530_v56 = vmin.u32 %v698_v36, %v3162_v27  ;;  %v850_v62 = vadd.s32 1, %v2537_v24  ;;  %vm3194_vm3 = vcmp.le.f32.partialorder %v528_v21, 0.7853982 }
  0xb6   : > { %v600_v39 = vsub.s32 32, %v599_v35  ;;  %v601_v40 = vshll.u32 %v3129_v45, %v599_v35  ;;  %v604_v47 = vsub.s32 4294967266, %v599_v35  ;;  %v783_v45 = vsel %vm769_vm1, %v780_v38, %v782_v44 }
  0xb7   : > { %v615_v2 = vsel %vm530_vm14, %v614_v26, %v3117_v34  ;;  %v700_v4 = vclz %v2530_v56  ;;  %v775_v51 = vsel %vm769_vm1, %v772_v32, %v774_v37  ;;  %vm851_vm4 = vcmp.gt.s32.totalorder %v850_v62, 0 }
  0xb8   : > { %v602_v58 = vshrl.u32 %v584_v5, %v600_v39  ;;  %v605_v60 = vadd.s32 127, %v604_v47  ;;  %v3204_v9 = vmul.u32.u64.low %v3143_v3, %v783_v45  ;;  %v3205_v10 = vmul.u32.u64.high %v3143_v3, %v783_v45, %v3204_v9 }
  0xb9   : > { %v2531_v11 = vadd.s32 4294967294, %v700_v4  ;;  %v3208_v21 = vmul.u32.u64.low %v3143_v3, %v779_v17  ;;  %v3209_v12 = vmul.u32.u64.high %v3143_v3, %v779_v17, %v3208_v21  ;;  %v848_v34 = vor.u32 8388608, %v3188_v46 }
  0xba   : > { %v603_v5 = vor.u32 %v602_v58, %v601_v40  ;;  %v606_v6 = vshll.u32 %v605_v60, 23  ;;  %v852_v41 = vsel %vm851_vm4, %v850_v62, 0  ;;  %v3215_v52 = vsel %vm3194_vm3, 0, %v615_v2 }
  0xbb   : > { %v688_v42 = vadd.s32 %v3103_v28, %v3113_v33  ;;  %vm2532_vm5 = vcmp.lt.s32.totalorder %v2531_v11, 0  ;;  %v854_v15 = vand.u32 31, %v852_v41  ;;  %v791_v23 = vmul.u32 %v3143_v3, %v775_v51 }
  0xbc   : > { %v607_v13 = vor.u32 4788187, %v606_v6  ;;  %v610_v14 = vcvt.s32.f32 %v603_v5  ;;  %v703_v22 = vsel %vm2532_vm5, 0, %v2531_v11  ;;  %vm793_vm6 = vc.u32 %v3205_v10, %v3208_v21 }
  0xbd   : > { %v704_v24 = vsub.s32 32, %v703_v22  ;;  %v705_v26 = vshll.u32 %v3162_v27, %v703_v22  ;;  %v708_v29 = vsub.s32 4294967266, %v703_v22  ;;  %v794_v32 = vadd.s32 1, %v3209_v12 }
  0xbe   : > { %v608_v16 = vand.u32 2147483647, %v607_v13  ;;  %v621_v1 = vadd.s32 3, %v3215_v52  ;;  %v3225_v35 = vshrl.u32 %v852_v41, 5  ;;  %v855_v28 = vsub.s32 32, %v854_v15 }
  0xbf   : > { %v706_v33 = vshrl.u32 %v688_v42, %v704_v24  ;;  %v709_v36 = vadd.s32 127, %v708_v29  ;;  %v795_v37 = vsel %vm793_vm6, %v794_v32, %v3209_v12  ;;  %v857_v3 = vshll.u32 %v2849_v55, %v854_v15 }
  0xc0   : > { %v611_v53 = vmul.f32 %v610_v14, %v608_v16  ;;  %vm634_vm7 = vcmp.lt.s32.totalorder %v3019_v19, 0  ;;  %v796_v39 = vadd.s32 %v795_v37, %v791_v23  ;;  %v858_v27 = vshrl.u32 %v2850_v57, %v855_v28 }
  0xc1   : > { %v860_v40 = vshll.u32 %v2850_v57, %v854_v15  ;;  %vm3234_vm8 = vcmp.le.f32.partialorder %v632_v25, 0.7853982  ;;  %v707_v54 = vor.u32 %v706_v33, %v705_v26  ;;  %v710_v56 = vshll.u32 %v709_v36, 23 }
  0xc2   : > { %v612_v38 = vxor.u32 2147483648, %v611_v53  ;;  %v861_v17 = vshrl.u32 %v2851_v59, %v855_v28  ;;  %v863_v44 = vshll.u32 %v2851_v59, %v854_v15  ;;  %v797_v58 = vadd.s32 536870912, %v796_v39 }
  0xc3   : > { %v864_v60 = vshrl.u32 %v2852_v61, %v855_v28  ;;  %v866_v45 = vshll.u32 %v2852_v61, %v854_v15  ;;  %v711_v62 = vor.u32 4788187, %v710_v56  ;;  %v714_v2 = vcvt.s32.f32 %v707_v54 }
  0xc4   : > { %v613_v46 = vsel %vm530_vm14, %v612_v38, %v611_v53  ;;  %v859_v4 = vor.u32 %v858_v27, %v857_v3  ;;  %v798_v51 = vshrl.u32 %v797_v58, 30  ;;  %v862_v5 = vor.u32 %v861_v17, %v860_v40 }
  0xc5   : > { %v616_v25 = vsel %vm3194_vm3, %v3016_v18, %v613_v46  ;;  %v867_v6 = vshrl.u32 %v2853_v63, %v855_v28  ;;  %v712_v9 = vand.u32 2147483647, %v711_v62  ;;  %v869_v11 = vshll.u32 %v2853_v63, %v854_v15 }
  0xc6   : > { %2713 = vcosq.f32 %v616_v25  ;;  %v870_v12 = vshrl.u32 %v2854_v8, %v855_v28  ;;  %v718_v13 = vsub.s32 4, %v3150_v50  ;;  %v799_v14 = vshll.u32 %v798_v51, 30 }
  0xc7   : > { %2715 = vsinq.f32 %v616_v25  ;;  %v868_v41 = vor.u32 %v867_v6, %v866_v45  ;;  %vm872_vm9 = vcmp.lt.s32.totalorder %v3225_v35, 1  ;;  %v715_v0 = vmul.f32 %v714_v2, %v712_v9 }
  0xc8   : > { %v856_v42 = vshrl.u32 %v2849_v55, %v855_v28  ;;  %v865_v16 = vor.u32 %v864_v60, %v863_v44  ;;  %v3253_v22 = vshll.u32 %v848_v34, 8  ;;  %vm738_vm10 = vcmp.lt.s32.totalorder %v3022_v20, 0 }
  0xc9   : > { %v3256_v23 = vsub.s32 %v796_v39, %v799_v14  ;;  %v871_v24 = vor.u32 %v870_v12, %v869_v11  ;;  %vm874_vm11 = vcmp.lt.s32.totalorder %v3225_v35, 3  ;;  %vm875_vm12 = vcmp.lt.s32.totalorder %v3225_v35, 4 }
  0xca   : > { %v716_v15 = vxor.u32 2147483648, %v715_v0  ;;  %vm873_vm13 = vcmp.lt.s32.totalorder %v3225_v35, 2  ;;  %v877_v26 = vsel %vm875_vm12, %v865_v16, 2102212464  ;;  %v880_v29 = vsel %vm872_vm9, %v859_v4, %v862_v5 }
  0xcb   : > { %v3265_v34 = vand.u32 3, %v621_v1  ;;  %v719_v32 = vsel %vm634_vm7, %v718_v13, %v3150_v50  ;;  %v802_v53 = vsub.s32 0, %v3256_v23  ;;  %v881_v28 = vsel %vm875_vm12, %v868_v41, 920167782 }
  0xcc   : > { %v717_v33 = vsel %vm634_vm7, %v716_v15, %v715_v0  ;;  %vm3277_vm14 = vcmp.le.f32.partialorder %v736_v49, 0.7853982  ;;  %v822_v1 = vsub.s32 4, %v798_v51  ;;  %v876_v37 = vsel %vm872_vm9, %v856_v42, %v859_v4 }
  0xcd   : > { %v882_v50 = vsel %vm874_vm11, %v865_v16, %v881_v28  ;;  %v720_v3 = vsel %vm3234_vm8, %v3019_v19, %v717_v33  ;;  %v2534_v38 = vmin.u32 %v802_v53, %v3256_v23  ;;  %v878_v39 = vsel %vm874_vm11, %v862_v5, %v877_v26 }
  0xce   : > { %v883_v49 = vsel %vm873_vm13, %v880_v29, %v882_v50  ;;  %v884_v27 = vsel %vm872_vm9, %v862_v5, %v865_v16  ;;  %v885_v40 = vsel %vm875_vm12, %v871_v24, 1326507024  ;;  %vm623_vm15 = vcmp.lt.s32.totalorder %v3265_v34, 2 }
  0xcf   : > { %v3298_v54 = vmul.u32.u64.low %v3253_v22, %v883_v49  ;;  %v3299_v56 = vmul.u32.u64.high %v3253_v22, %v883_v49, %v3298_v54  ;;  %vm624_vm0 = vcmp.eq.s32.totalorder %v3265_v34, 0  ;;  %vm627_vm1 = vcmp.eq.s32.totalorder %v3265_v34, 2 }
  0xd0   : > { %2717 = vcosq.f32 %v720_v3  ;;  %v804_v17 = vclz %v2534_v38  ;;  %v3307_v44 = vsel %vm3234_vm8, 0, %v719_v32  ;;  %v792_v46 = vadd.s32 %v3208_v21, %v3205_v10 }
  0xd1   : > { %2719 = vsinq.f32 %v720_v3  ;;  %v886_v58 = vsel %vm874_vm11, %v868_v41, %v885_v40  ;;  %v879_v45 = vsel %vm873_vm13, %v876_v37, %v878_v39  ;;  %v947_v62 = vand.u32 2139095040, %v3124_v43 }
  0xd2   : > { %v2535_v60 = vadd.s32 4294967294, %v804_v17  ;;  %v887_v25 = vsel %vm873_vm13, %v884_v27, %v886_v58  ;;  %v823_v47 = vsel %vm738_vm10, %v822_v1, %v798_v51  ;;  %v944_v21 = vand.u32 2147483647, %v3124_v43 }
  0xd3   : > { %v3318_v2 = vpop.eup %2713  ;;  %v3323_v4 = vmul.u32.u64.low %v3253_v22, %v887_v25  ;;  %v3324_v10 = vmul.u32.u64.high %v3253_v22, %v887_v25, %v3323_v4  ;;  %v898_v35 = vadd.s32 1, %v3299_v56  ;;  %v948_v9 = vshrl.u32 %v947_v62, 23 }
  0xd4   : > { %v3327_v5 = vpop.eup %2715  ;;  %v628_v6 = vxor.u32 2147483648, %v3318_v2  ;;  %vm2536_vm2 = vcmp.lt.s32.totalorder %v2535_v60, 0  ;;  %v725_v12 = vadd.s32 3, %v3307_v44  ;;  %v895_v51 = vmul.u32 %v3253_v22, %v879_v45 }
  0xd5   : > { %v625_v11 = vxor.u32 2147483648, %v3327_v5  ;;  %v807_v13 = vsel %vm2536_vm2, 0, %v2535_v60  ;;  %v3337_v42 = vsel %vm3277_vm14, 0, %v823_v47  ;;  %vm897_vm3 = vc.u32 %v3324_v10, %v3298_v54 }
  0xd6   : > { %v808_v14 = vsub.s32 32, %v807_v13  ;;  %v809_v41 = vshll.u32 %v3256_v23, %v807_v13  ;;  %v812_v0 = vsub.s32 4294967266, %v807_v13  ;;  %v629_v16 = vsel %vm627_vm1, %v628_v6, %v3327_v5 }
  0xd7   : > { %v2541_v24 = vadd.s32 4294967169, %v948_v9  ;;  %v951_v15 = vand.u32 8388607, %v944_v21  ;;  %v626_v22 = vsel %vm624_vm0, %v3318_v2, %v625_v11  ;;  %v899_v29 = vsel %vm897_vm3, %v898_v35, %v3299_v56 }
  0xd8   : > { %v810_v23 = vshrl.u32 %v792_v46, %v808_v14  ;;  %v813_v26 = vadd.s32 127, %v812_v0  ;;  %v900_v32 = vadd.s32 %v899_v29, %v895_v51  ;;  %v3351_v28 = vand.u32 3, %v3215_v52 }
  0xd9   : > { %v954_v53 = vadd.s32 1, %v2541_v24  ;;  %v3353_v33 = vand.u32 3, %v725_v12  ;;  %v829_v50 = vadd.s32 3, %v3337_v42  ;;  %vm620_vm4 = vweird.f32 %v3016_v18 }
  0xda   : > { %v811_v1 = vor.u32 %v810_v23, %v809_v41  ;;  %v814_v37 = vshll.u32 %v813_v26, 23  ;;  %v630_v3 = vsel %vm623_vm15, %v626_v22, %v629_v16  ;;  %v901_v38 = vadd.s32 536870912, %v900_v32 }
  0xdb   : > { %vm955_vm5 = vcmp.gt.s32.totalorder %v954_v53, 0  ;;  %v952_v27 = vor.u32 8388608, %v951_v15  ;;  %vm1143_vm6 = vcmp.eq.s32.totalorder %v3351_v28, 0  ;;  %vm731_vm7 = vcmp.eq.s32.totalorder %v3353_v33, 2 }
  0xdc   : > { %v815_v39 = vor.u32 4788187, %v814_v37  ;;  %v818_v49 = vcvt.s32.f32 %v811_v1  ;;  %v956_v40 = vsel %vm955_vm5, %v954_v53, 0  ;;  %v902_v52 = vshrl.u32 %v901_v38, 30 }
  0xdd   : > { %v3359_v56 = vpop.eup %2717  ;;  %v958_v17 = vand.u32 31, %v956_v40  ;;  %v3365_v60 = vand.u32 3, %v829_v50  ;;  %v3369_v34 = vadd.s32 %v3298_v54, %v3324_v10  ;;  %v3373_v45 = vsel %vm620_vm4, nan, %v630_v3 }
  0xde   : > { %v3362_v46 = vpop.eup %2719  ;;  %v816_v58 = vand.u32 2147483647, %v815_v39  ;;  %vm842_vm8 = vcmp.lt.s32.totalorder %v3109_v30, 0  ;;  %v903_v25 = vshll.u32 %v902_v52, 30  ;;  %vm1146_vm9 = vcmp.eq.s32.totalorder %v3351_v28, 2 }
  0xdf   : > { %v959_v62 = vsub.s32 32, %v958_v17  ;;  %v732_v47 = vxor.u32 2147483648, %v3359_v56  ;;  %v3378_v35 = vshll.u32 %v952_v27, 8  ;;  %v3381_v9 = vsel %vm1143_vm6, %v3318_v2, %v625_v11 }
  0xe0   : > { %v819_v4 = vmul.f32 %v818_v49, %v816_v58  ;;  %v729_v54 = vxor.u32 2147483648, %v3362_v46  ;;  %v3384_v10 = vsub.s32 %v900_v32, %v903_v25  ;;  %v3386_v12 = vshrl.u32 %v956_v40, 5 }
  0xe1   : > { %v961_v13 = vshll.u32 %v2849_v55, %v958_v17  ;;  %v962_v14 = vshrl.u32 %v2850_v57, %v959_v62  ;;  %v964_v41 = vshll.u32 %v2850_v57, %v958_v17  ;;  %v3392_v0 = vsel %vm1146_vm9, %v628_v6, %v3327_v5 }
  0xe2   : > { %v820_v51 = vxor.u32 2147483648, %v819_v4  ;;  %vm728_vm11 = vcmp.eq.s32.totalorder %v3353_v33, 0  ;;  %v906_v2 = vsub.s32 0, %v3384_v10  ;;  %v965_v11 = vshrl.u32 %v2851_v59, %v959_v62 }
  0xe3   : > { %v967_v16 = vshll.u32 %v2851_v59, %v958_v17  ;;  %v3399_v24 = vand.u32 3, %v3307_v44  ;;  %v926_v22 = vsub.s32 4, %v902_v52  ;;  %v968_v57 = vshrl.u32 %v2852_v61, %v959_v62 }
  0xe4   : > { %v821_v15 = vsel %vm738_vm10, %v820_v51, %v819_v4  ;;  %v970_v5 = vshll.u32 %v2852_v61, %v958_v17  ;;  %v2538_v23 = vmin.u32 %v906_v2, %v3384_v10  ;;  %v960_v26 = vshrl.u32 %v2849_v55, %v959_v62 }
  0xe5   : > { %v824_v6 = vsel %vm3277_vm14, %v3022_v20, %v821_v15  ;;  %v963_v59 = vor.u32 %v962_v14, %v961_v13  ;;  %vm3412_vm12 = vcmp.le.f32.partialorder %v840_v48, 0.7853982  ;;  %v966_v29 = vor.u32 %v965_v11, %v964_v41 }
  0xe6   : > { %2721 = vcosq.f32 %v824_v6  ;;  %v971_v32 = vshrl.u32 %v2853_v63, %v959_v62  ;;  %v973_v61 = vshll.u32 %v2853_v63, %v958_v17  ;;  %v733_v36 = vsel %vm731_vm7, %v732_v47, %v3362_v46 }
  0xe7   : > { %2723 = vsinq.f32 %v824_v6  ;;  %v908_v55 = vclz %v2538_v23  ;;  %v969_v53 = vor.u32 %v968_v57, %v967_v16  ;;  %vm727_vm10 = vcmp.lt.s32.totalorder %v3353_v33, 2 }
  0xe8   : > { %v927_v48 = vsel %vm842_vm8, %v926_v22, %v902_v52  ;;  %v972_v1 = vor.u32 %v971_v32, %v970_v5  ;;  %v974_v37 = vshrl.u32 %v2854_v8, %v959_v62  ;;  %vm976_vm13 = vcmp.lt.s32.totalorder %v3386_v12, 1 }
  0xe9   : > { %v2539_v63 = vadd.s32 4294967294, %v908_v55  ;;  %vm977_vm14 = vcmp.lt.s32.totalorder %v3386_v12, 2  ;;  %vm978_vm15 = vcmp.lt.s32.totalorder %v3386_v12, 3  ;;  %vm979_vm0 = vcmp.lt.s32.totalorder %v3386_v12, 4 }
  0xea   : > { %vm1142_vm1 = vcmp.lt.s32.totalorder %v3351_v28, 2  ;;  %v975_v50 = vor.u32 %v974_v37, %v973_v61  ;;  %v980_v3 = vsel %vm976_vm13, %v960_v26, %v963_v59  ;;  %v981_v38 = vsel %vm979_vm0, %v969_v53, 2102212464 }
  0xeb   : > { %v984_v39 = vsel %vm976_vm13, %v963_v59, %v966_v29  ;;  %vm835_vm2 = vcmp.eq.s32.totalorder %v3365_v60, 2  ;;  %vm2540_vm3 = vcmp.lt.s32.totalorder %v2539_v63, 0  ;;  %v982_v8 = vsel %vm978_vm15, %v966_v29, %v981_v38 }
  0xec   : > { %v985_v49 = vsel %vm979_vm0, %v972_v1, 920167782  ;;  %v988_v27 = vsel %vm976_vm13, %v966_v29, %v969_v53  ;;  %vm832_vm5 = vcmp.eq.s32.totalorder %v3365_v60, 0  ;;  %v911_v40 = vsel %vm2540_vm3, 0, %v2539_v63 }
  0xed   : > { %v983_v52 = vsel %vm977_vm14, %v980_v3, %v982_v8  ;;  %v986_v17 = vsel %vm978_vm15, %v969_v53, %v985_v49  ;;  %v989_v58 = vsel %vm979_vm0, %v975_v50, 1326507024  ;;  %vm724_vm6 = vweird.f32 %v3019_v19 }
  0xee   : > { %vm831_vm7 = vcmp.lt.s32.totalorder %v3365_v60, 2  ;;  %v912_v25 = vsub.s32 32, %v911_v40  ;;  %v913_v62 = vshll.u32 %v3384_v10, %v911_v40  ;;  %v916_v4 = vsub.s32 4294967266, %v911_v40 }
  0xef   : > { %v987_v13 = vsel %vm977_vm14, %v984_v39, %v986_v17  ;;  %v730_v51 = vsel %vm728_vm11, %v3359_v56, %v729_v54  ;;  %v990_v14 = vsel %vm978_vm15, %v972_v1, %v989_v58  ;;  %vm828_vm9 = vweird.f32 %v3022_v20 }
  0xf0   : > { %v3453_v41 = vmul.u32.u64.low %v3378_v35, %v987_v13  ;;  %v3454_v2 = vmul.u32.u64.high %v3378_v35, %v987_v13, %v3453_v41  ;;  %v914_v10 = vshrl.u32 %v3369_v34, %v912_v25  ;;  %v917_v11 = vadd.s32 127, %v916_v4 }
  0xf1   : > { %v929_v16 = vsel %vm3412_vm12, 0, %v927_v48  ;;  %v991_v15 = vsel %vm977_vm14, %v988_v27, %v990_v14  ;;  %v999_v5 = vmul.u32 %v3378_v35, %v983_v52  ;;  %vm1245_vm11 = vcmp.lt.s32.totalorder %v3399_v24, 2 }
  0xf2   : > { %v3464_v22 = vmul.u32.u64.low %v3378_v35, %v991_v15  ;;  %v3465_v57 = vmul.u32.u64.high %v3378_v35, %v991_v15, %v3464_v22  ;;  %v915_v6 = vor.u32 %v914_v10, %v913_v62  ;;  %v918_v23 = vshll.u32 %v917_v11, 23 }
  0xf3   : > { %vm1246_vm13 = vcmp.eq.s32.totalorder %v3399_v24, 0  ;;  %vm1249_vm15 = vcmp.eq.s32.totalorder %v3399_v24, 2  ;;  %v1002_v34 = vadd.s32 1, %v3454_v2  ;;  %v1347_v26 = vand.u32 3, %v3337_v42  ;;  %v2722_v59 = vpop.eup %2721 }
  0xf4   : > { %v1248_v12 = vsel %vm1246_vm13, %v3359_v56, %v729_v54  ;;  %v1251_v35 = vsel %vm1249_vm15, %v732_v47, %v3362_v46  ;;  %v734_v29 = vsel %vm727_vm10, %v730_v51, %v733_v36  ;;  %v919_v32 = vor.u32 4788187, %v918_v23  ;;  %v2724_v53 = vpop.eup %2723 }
  0xf5   : > { %v922_v61 = vcvt.s32.f32 %v915_v6  ;;  %v933_v55 = vadd.s32 3, %v929_v16  ;;  %v836_v48 = vxor.u32 2147483648, %v2722_v59  ;;  %vm1001_vm14 = vc.u32 %v3465_v57, %v3453_v41 }
  0xf6   : > { %v1149_v42 = vsel %vm1142_vm1, %v3381_v9, %v3392_v0  ;;  %v1252_v56 = vsel %vm1245_vm11, %v1248_v12, %v1251_v35  ;;  %v833_v33 = vxor.u32 2147483648, %v2724_v53  ;;  %v920_v46 = vand.u32 2147483647, %v919_v32 }
  0xf7   : > { %vm946_vm10 = vcmp.lt.s32.totalorder %v3124_v43, 0  ;;  %v1003_v47 = vsel %vm1001_vm14, %v1002_v34, %v3454_v2  ;;  %vm1348_vm0 = vcmp.lt.s32.totalorder %v1347_v26, 2  ;;  %v837_v54 = vsel %vm835_vm2, %v836_v48, %v2724_v53 }
  0xf8   : > { %vm3503_vm3 = vcmp.le.f32.partialorder %v944_v21, 0.7853982  ;;  %v1004_v9 = vadd.s32 %v1003_v47, %v999_v5  ;;  %vm1349_vm1 = vcmp.eq.s32.totalorder %v1347_v26, 0  ;;  %vm1352_vm11 = vcmp.eq.s32.totalorder %v1347_v26, 2 }
  0xf9   : > { %v834_v0 = vsel %vm832_vm5, %v2722_v59, %v833_v33  ;;  %v923_v24 = vmul.f32 %v922_v61, %v920_v46  ;;  %v1351_v36 = vsel %vm1349_vm1, %v2722_v59, %v833_v33  ;;  %v1354_v1 = vsel %vm1352_vm11, %v836_v48, %v2724_v53 }
  0xfa   : > { %v3511_v37 = vsel %vm724_vm6, nan, %v734_v29  ;;  %v838_v21 = vsel %vm831_vm7, %v834_v0, %v837_v54  ;;  %v1005_v63 = vadd.s32 536870912, %v1004_v9  ;;  %v1355_v50 = vsel %vm1348_vm0, %v1351_v36, %v1354_v1 }
  0xfb   : > { %v924_v3 = vxor.u32 2147483648, %v923_v24  ;;  %v3515_v38 = vand.u32 3, %v933_v55  ;;  %v3519_v39 = vsel %vm620_vm4, nan, %v1149_v42  ;;  %v3521_v8 = vand.u32 3, %v929_v16 }
  0xfc   : > { %v3527_v49 = vsel %vm828_vm9, nan, %v838_v21  ;;  %v1006_v60 = vshrl.u32 %v1005_v63, 30  ;;  %v3531_v27 = vsel %vm724_vm6, nan, %v1252_v56  ;;  %v3535_v40 = vsel %vm828_vm9, nan, %v1355_v50 }
  0xfd   : > { %v925_v18 = vsel %vm842_vm8, %v924_v3, %v923_v24  ;;  %v3540_v52 = vstv %s3481_s30  ;;  %v3543_v17 = vstv %s3471_s8  ;;  %v3546_v58 = vstv %s3485_s10  ;;  %s4032_s8 = sld [smem:[#allocation9 + $0x4]] }
  0xfe   : > { %v928_v25 = vsel %vm3412_vm12, %v3109_v30, %v925_v18  ;;  %v1007_v19 = vshll.u32 %v1006_v60, 30  ;;  %v1030_v62 = vsub.s32 4, %v1006_v60  ;;  %v1571_v20 = vmul.f32 %v3543_v17, %v3373_v45  ;;  %s4076_s30 = sld [smem:[#allocation7 + $0xe]] }
  0xff   : > { %2725 = vcosq.f32 %v928_v25  ;;  %v1572_v4 = vmul.f32 %v3543_v17, %v3511_v37  ;;  %v1573_v13 = vmul.f32 %v3543_v17, %v3527_v49  ;;  %v3558_v51 = vstv %s3497_s11  ;;  %s4092_s10 = sld [smem:[#allocation9 + $0xe]] }
 0x100   : > { %2727 = vsinq.f32 %v928_v25  ;;  %v3562_v44 = vsub.s32 %v1004_v9, %v1007_v19  ;;  %v1031_v14 = vsel %vm946_vm10, %v1030_v62, %v1006_v60  ;;  %v1583_v2 = vmul.f32 %v3546_v58, %v3519_v39  ;;  %s4129_s11 = sld [smem:[#allocation7 + $0x5]] }
 0x101   : > { %v1033_v10 = vsel %vm3503_vm3, 0, %v1031_v14  ;;  %v1576_v11 = vadd.f32 %v1571_v20, %v3540_v52  ;;  %v1577_v16 = vadd.f32 %v1572_v4, %v3540_v52  ;;  %v1584_v15 = vmul.f32 %v3546_v58, %v3531_v27 }
 0x102   : > { %v1010_v22 = vsub.s32 0, %v3562_v44  ;;  %v1037_v5 = vadd.s32 3, %v1033_v10  ;;  %v1578_v6 = vadd.f32 %v1573_v13, %v3540_v52  ;;  %v1585_v23 = vmul.f32 %v3546_v58, %v3535_v40 }
 0x103   : > { %v502_v34 = vand.u32 2147483647, %v3006_v31  ;;  %v3580_v12 = vstv %s3523_s12  ;;  %v1595_v35 = vmul.f32 %v3558_v51, %v3373_v45  ;;  %v1596_v26 = vmul.f32 %v3558_v51, %v3511_v37  ;;  %s4134_s12 = sld [smem:[#allocation7 + $0xf]] }
 0x104   : > { %vm939_vm4 = vcmp.eq.s32.totalorder %v3515_v38, 2  ;;  %v1000_v59 = vadd.s32 %v3453_v41, %v3465_v57  ;;  %v2542_v29 = vmin.u32 %v1010_v22, %v3562_v44  ;;  %vm1455_vm8 = vcmp.eq.s32.totalorder %v3521_v8, 2 }
 0x105   : > { %vm936_vm12 = vcmp.eq.s32.totalorder %v3515_v38, 0  ;;  %vm1452_vm2 = vcmp.eq.s32.totalorder %v3521_v8, 0  ;;  %v3593_v32 = vand.u32 3, %v1033_v10  ;;  %v3595_v61 = vadd.f32 %v1583_v2, %v1576_v11 }
 0x106   : > { %v3597_v55 = vadd.f32 %v1584_v15, %v1577_v16  ;;  %v1597_v53 = vmul.f32 %v3558_v51, %v3527_v49  ;;  %vm935_vm5 = vcmp.lt.s32.totalorder %v3515_v38, 2  ;;  %v1012_v41 = vclz %v2542_v29 }
 0x107   : > { %v3602_v57 = vand.u32 3, %v1037_v5  ;;  %vm1451_vm6 = vcmp.lt.s32.totalorder %v3521_v8, 2  ;;  %v3605_v48 = vadd.f32 %v1585_v23, %v1578_v6  ;;  %v1600_v42 = vadd.f32 %v1595_v35, %v3580_v12 }
 0x108   : > { %vm932_vm7 = vweird.f32 %v3109_v30  ;;  %v1601_v56 = vadd.f32 %v1596_v26, %v3580_v12  ;;  %v1602_v33 = vadd.f32 %v1597_v53, %v3580_v12  ;;  %v3614_v46 = vstv %s3560_s15  ;;  %s4142_s15 = sld [smem:[#allocation9 + $0x5]] }
 0x109   : > { %v1617_v47 = vmul.f32 %v3519_v39, %v3373_v45  ;;  %v2543_v54 = vadd.s32 4294967294, %v1012_v41  ;;  %v1607_v9 = vmul.f32 %v3614_v46, %v3519_v39  ;;  %v1608_v0 = vmul.f32 %v3614_v46, %v3531_v27 }
 0x10a   : > { %v1609_v24 = vmul.f32 %v3614_v46, %v3535_v40  ;;  %v1618_v36 = vmul.f32 %v3531_v27, %v3511_v37  ;;  %v1619_v1 = vmul.f32 %v3535_v40, %v3527_v49  ;;  %v1627_v63 = vmul.f32 %v3519_v39, %v3519_v39 }
 0x10b   : > { %v3628_v21 = vadd.f32 %v1617_v47, %v1617_v47  ;;  %vm2544_vm9 = vcmp.lt.s32.totalorder %v2543_v54, 0  ;;  %v3632_v50 = vadd.f32 %v1607_v9, %v1600_v42  ;;  %v3634_v3 = vadd.f32 %v1608_v0, %v1601_v56 }
 0x10c   : > { %v3636_v60 = vadd.f32 %v1609_v24, %v1602_v33  ;;  %v1015_v18 = vsel %vm2544_vm9, 0, %v2543_v54  ;;  %v3638_v25 = vadd.f32 %v1618_v36, %v1618_v36  ;;  %v3640_v19 = vadd.f32 %v1619_v1, %v1619_v1  ;;  %v2726_v20 = vpop.eup %2725 }
 0x10d   : > { %v1628_v62 = vmul.f32 %v3531_v27, %v3531_v27  ;;  %v1016_v4 = vsub.s32 32, %v1015_v18  ;;  %v1017_v13 = vshll.u32 %v3562_v44, %v1015_v18  ;;  %v1020_v14 = vsub.s32 4294967266, %v1015_v18  ;;  %v2728_v10 = vpop.eup %2727 }
 0x10e   : > { %v1629_v2 = vmul.f32 %v3535_v40, %v3535_v40  ;;  %v940_v11 = vxor.u32 2147483648, %v2726_v20  ;;  %v1632_v16 = vmul.f32 %v3373_v45, %v3373_v45  ;;  %v1633_v15 = vmul.f32 %v3511_v37, %v3511_v37 }
 0x10f   : > { %v1634_v22 = vmul.f32 %v3527_v49, %v3527_v49  ;;  %v937_v5 = vxor.u32 2147483648, %v2728_v10  ;;  %v1018_v6 = vshrl.u32 %v1000_v59, %v1016_v4  ;;  %v1021_v23 = vadd.s32 127, %v1020_v14 }
 0x110   : > { %v3654_v35 = vstv %s3608_s16  ;;  %v941_v44 = vsel %vm939_vm4, %v940_v11, %v2728_v10  ;;  %v1457_v26 = vsel %vm1455_vm8, %v940_v11, %v2728_v10  ;;  %v3660_v29 = vsub.f32 %v1627_v63, %v1632_v16  ;;  %s4195_s16 = sld [smem:[#allocation9 + $0xf]] }
 0x111   : > { %v3662_v53 = vsub.f32 %v1628_v62, %v1633_v15  ;;  %v938_v41 = vsel %vm936_vm12, %v2726_v20, %v937_v5  ;;  %v1019_v42 = vor.u32 %v1018_v6, %v1017_v13  ;;  %v1022_v59 = vshll.u32 %v1021_v23, 23 }
 0x112   : > { %v1454_v56 = vsel %vm1452_vm2, %v2726_v20, %v937_v5  ;;  %v942_v33 = vsel %vm935_vm5, %v938_v41, %v941_v44  ;;  %v3676_v54 = vsub.f32 %v1629_v2, %v1634_v22  ;;  %v1644_v9 = vmul.f32 %v3654_v35, %v3628_v21 }
 0x113   : > { %v1458_v47 = vsel %vm1451_vm6, %v1454_v56, %v1457_v26  ;;  %v3682_v0 = vsel %vm932_vm7, nan, %v942_v33  ;;  %v1023_v24 = vor.u32 4788187, %v1022_v59  ;;  %v1026_v36 = vcvt.s32.f32 %v1019_v42 }
 0x114   : > { %v3686_v1 = vsel %vm932_vm7, nan, %v1458_v47  ;;  %v1574_v38 = vmul.f32 %v3543_v17, %v3682_v0  ;;  %v1598_v63 = vmul.f32 %v3558_v51, %v3682_v0  ;;  %v1635_v4 = vmul.f32 %v3682_v0, %v3682_v0 }
 0x115   : > { %v1586_v8 = vmul.f32 %v3546_v58, %v3686_v1  ;;  %v1610_v18 = vmul.f32 %v3614_v46, %v3686_v1  ;;  %v1024_v62 = vand.u32 2147483647, %v1023_v24  ;;  %v1620_v20 = vmul.f32 %v3686_v1, %v3682_v0 }
 0x116   : > { %v1630_v30 = vmul.f32 %v3686_v1, %v3686_v1  ;;  %v1579_v13 = vadd.f32 %v1574_v38, %v3540_v52  ;;  %v1603_v14 = vadd.f32 %v1598_v63, %v3580_v12  ;;  %v1645_v2 = vmul.f32 %v3654_v35, %v3638_v25 }
 0x117   : > { %v1646_v10 = vmul.f32 %v3654_v35, %v3640_v19  ;;  %v1027_v11 = vmul.f32 %v1026_v36, %v1024_v62  ;;  %v3710_v16 = vadd.f32 %v1620_v20, %v1620_v20  ;;  %v1649_v22 = vadd.f32 %v1644_v9, %v3595_v61 }
 0x118   : > { %v1640_v15 = vsub.f32 %v1630_v30, %v1635_v4  ;;  %v1591_v5 = vadd.f32 %v1586_v8, %v1579_v13  ;;  %v1615_v6 = vadd.f32 %v1610_v18, %v1603_v14  ;;  %v1650_v23 = vadd.f32 %v1645_v2, %v3597_v55 }
 0x119   : > { %v1651_v44 = vadd.f32 %v1646_v10, %v3605_v48  ;;  %v1028_v26 = vxor.u32 2147483648, %v1027_v11  ;;  %v1647_v41 = vmul.f32 %v3654_v35, %v3710_v16  ;;  %v3718_v42 = vstv %s3664_s17  ;;  %s4232_s17 = sld [smem:[#allocation7 + $0x6]] }
 0x11a   : > { %v3721_v59 = vstv %s3670_s18  ;;  %v1656_v56 = vmul.f32 %v3718_v42, %v3660_v29  ;;  %v1657_v61 = vmul.f32 %v3718_v42, %v3662_v53  ;;  %v1658_v33 = vmul.f32 %v3718_v42, %v3676_v54  ;;  %s4237_s18 = sld [smem:[#allocation9 + $0x6]] }
 0x11b   : > { %v1659_v55 = vmul.f32 %v3718_v42, %v1640_v15  ;;  %v1029_v48 = vsel %vm946_vm10, %v1028_v26, %v1027_v11  ;;  %v1652_v47 = vadd.f32 %v1647_v41, %v1591_v5  ;;  %v1668_v9 = vmul.f32 %v3721_v59, %v3628_v21 }
 0x11c   : > { %v1669_v24 = vmul.f32 %v3721_v59, %v3638_v25  ;;  %v1032_v36 = vsel %vm3503_vm3, %v3124_v43, %v1029_v48  ;;  %v1661_v38 = vadd.f32 %v1656_v56, %v1649_v22  ;;  %v1662_v8 = vadd.f32 %v1657_v61, %v1650_v23 }
 0x11d   : > { %v3739_v63 = vadd.f32 %v1658_v33, %v1651_v44  ;;  %2729 = vcosq.f32 %v1032_v36  ;;  %v3741_v18 = vadd.f32 %v1659_v55, %v1652_v47  ;;  %v1670_v62 = vmul.f32 %v3721_v59, %v3640_v19 }
 0x11e   : > { %v1671_v20 = vmul.f32 %v3721_v59, %v3710_v16  ;;  %2731 = vsinq.f32 %v1032_v36  ;;  %v1673_v30 = vadd.f32 %v1668_v9, %v3632_v50  ;;  %v1674_v28 = vadd.f32 %v1669_v24, %v3634_v3 }
 0x11f   : > { %v3752_v4 = vstv %s3708_s19  ;;  %v1675_v13 = vadd.f32 %v1670_v62, %v3636_v60  ;;  %v1690_v3 = vmul.f32 %v3628_v21, %v3519_v39  ;;  %v1691_v22 = vmul.f32 %v3638_v25, %v3531_v27  ;;  %s4281_s19 = sld [smem:[#allocation7 + $0x10]] }
 0x120   : > { %v1676_v14 = vadd.f32 %v1671_v20, %v1615_v6  ;;  %v1680_v2 = vmul.f32 %v3752_v4, %v3660_v29  ;;  %v1681_v10 = vmul.f32 %v3752_v4, %v3662_v53  ;;  %v1682_v11 = vmul.f32 %v3752_v4, %v3676_v54 }
 0x121   : > { %v1683_v50 = vmul.f32 %v3752_v4, %v1640_v15  ;;  %v1692_v6 = vmul.f32 %v3640_v19, %v3535_v40  ;;  %v1693_v23 = vmul.f32 %v3710_v16, %v3686_v1  ;;  %vm1043_vm13 = vcmp.eq.s32.totalorder %v3602_v57, 2 }
 0x122   : > { %v3768_v5 = vadd.f32 %v1680_v2, %v1673_v30  ;;  %v3770_v60 = vadd.f32 %v1681_v10, %v1674_v28  ;;  %vm1558_vm15 = vcmp.eq.s32.totalorder %v3593_v32, 2  ;;  %v3778_v44 = vadd.f32 %v1682_v11, %v1675_v13 }
 0x123   : > { %v3780_v26 = vadd.f32 %v1683_v50, %v1676_v14  ;;  %v1695_v41 = vmul.f32 %v3660_v29, %v3373_v45  ;;  %v1696_v56 = vmul.f32 %v3662_v53, %v3511_v37  ;;  %vm1040_vm14 = vcmp.eq.s32.totalorder %v3602_v57, 0 }
 0x124   : > { %vm1555_vm10 = vcmp.eq.s32.totalorder %v3593_v32, 0  ;;  %v1697_v61 = vmul.f32 %v3676_v54, %v3527_v49  ;;  %v1698_v33 = vmul.f32 %v1640_v15, %v3682_v0  ;;  %v1705_v55 = vmul.f32 %v3660_v29, %v3519_v39 }
 0x125   : > { %v1706_v48 = vmul.f32 %v3662_v53, %v3531_v27  ;;  %vm1039_vm0 = vcmp.lt.s32.totalorder %v3602_v57, 2  ;;  %vm1554_vm3 = vcmp.lt.s32.totalorder %v3593_v32, 2  ;;  %v3799_v47 = vadd.f32 %v1695_v41, %v1690_v3 }
 0x126   : > { %v3801_v9 = vadd.f32 %v1696_v56, %v1691_v22  ;;  %v1707_v24 = vmul.f32 %v3676_v54, %v3535_v40  ;;  %v1708_v29 = vmul.f32 %v1640_v15, %v3686_v1  ;;  %vm1036_vm1 = vweird.f32 %v3124_v43 }
 0x127   : > { %v3807_v36 = vadd.f32 %v1697_v61, %v1692_v6  ;;  %v3809_v53 = vadd.f32 %v1698_v33, %v1693_v23  ;;  %v1710_v62 = vmul.f32 %v3628_v21, %v3373_v45  ;;  %v1711_v20 = vmul.f32 %v3638_v25, %v3511_v37 }
 0x128   : > { %v1712_v30 = vmul.f32 %v3640_v19, %v3527_v49  ;;  %v1713_v54 = vmul.f32 %v3710_v16, %v3682_v0  ;;  %v3820_v28 = vstv %s3747_s9  ;;  %v3823_v15 = vstv %s3754_s13  ;;  %s4297_s9 = sld [smem:[#allocation9 + $0x10]] }
 0x129   : > { %v3825_v13 = vsub.f32 %v1705_v55, %v1710_v62  ;;  %v3827_v14 = vsub.f32 %v1706_v48, %v1711_v20  ;;  %v1722_v21 = vmul.f32 %v3820_v28, %v3799_v47  ;;  %v1723_v25 = vmul.f32 %v3820_v28, %v3801_v9  ;;  %s4334_s13 = sld [smem:[#allocation7 + $0x7]] }
 0x12a   : > { %v3833_v2 = vsub.f32 %v1707_v24, %v1712_v30  ;;  %v3835_v19 = vsub.f32 %v1708_v29, %v1713_v54  ;;  %v1724_v16 = vmul.f32 %v3820_v28, %v3807_v36  ;;  %v1725_v10 = vmul.f32 %v3820_v28, %v3809_v53  ;;  %v2730_v6 = vpop.eup %2729 }
 0x12b   : > { %v1727_v11 = vadd.f32 %v1722_v21, %v1661_v38  ;;  %v1728_v50 = vadd.f32 %v1723_v25, %v1662_v8  ;;  %v1734_v3 = vmul.f32 %v3823_v15, %v3825_v13  ;;  %v1735_v22 = vmul.f32 %v3823_v15, %v3827_v14  ;;  %v2732_v33 = vpop.eup %2731 }
 0x12c   : > { %v1729_v23 = vadd.f32 %v1724_v16, %v3739_v63  ;;  %v1730_v41 = vadd.f32 %v1725_v10, %v3741_v18  ;;  %v1736_v56 = vmul.f32 %v3823_v15, %v3833_v2  ;;  %v1737_v61 = vmul.f32 %v3823_v15, %v3835_v19 }
 0x12d   : > { %v1044_v38 = vxor.u32 2147483648, %v2730_v6  ;;  %v3853_v8 = vadd.f32 %v1734_v3, %v1727_v11  ;;  %v3855_v55 = vadd.f32 %v1735_v22, %v1728_v50  ;;  %v3858_v48 = vstv %s3795_s20  ;;  %s4339_s20 = sld [smem:[#allocation7 + $0x11]] }
 0x12e   : > { %v1041_v24 = vxor.u32 2147483648, %v2732_v33  ;;  %v3860_v29 = vadd.f32 %v1736_v56, %v1729_v23  ;;  %v3862_v63 = vadd.f32 %v1737_v61, %v1730_v41  ;;  %v1746_v18 = vmul.f32 %v3858_v48, %v3799_v47 }
 0x12f   : > { %v1045_v62 = vsel %vm1043_vm13, %v1044_v38, %v2732_v33  ;;  %v1560_v20 = vsel %vm1558_vm15, %v1044_v38, %v2732_v33  ;;  %v1747_v30 = vmul.f32 %v3858_v48, %v3801_v9  ;;  %v1748_v54 = vmul.f32 %v3858_v48, %v3807_v36 }
 0x130   : > { %v1042_v21 = vsel %vm1040_vm14, %v2730_v6, %v1041_v24  ;;  %v1557_v25 = vsel %vm1555_vm10, %v2730_v6, %v1041_v24  ;;  %v1749_v16 = vmul.f32 %v3858_v48, %v3809_v53  ;;  %v1751_v10 = vadd.f32 %v1746_v18, %v3768_v5 }
 0x131   : > { %v1046_v11 = vsel %vm1039_vm0, %v1042_v21, %v1045_v62  ;;  %v1561_v50 = vsel %vm1554_vm3, %v1557_v25, %v1560_v20  ;;  %v1752_v3 = vadd.f32 %v1747_v30, %v3770_v60  ;;  %v1753_v22 = vadd.f32 %v1748_v54, %v3778_v44 }
 0x132   : > { %v3889_v23 = vsel %vm1036_vm1, nan, %v1046_v11  ;;  %v3893_v6 = vsel %vm1036_vm1, nan, %v1561_v50  ;;  %v1754_v5 = vadd.f32 %v1749_v16, %v3780_v26  ;;  %v1757_v41 = vstv %s3841_s21  ;;  %s4347_s21 = sld [smem:[#allocation9 + $0x7]] }
 0x133   : > { %v1575_v57 = vmul.f32 %v3543_v17, %v3889_v23  ;;  %v1587_v32 = vmul.f32 %v3546_v58, %v3893_v6  ;;  %v1599_v60 = vmul.f32 %v3558_v51, %v3889_v23  ;;  %v1611_v44 = vmul.f32 %v3614_v46, %v3893_v6 }
 0x134   : > { %v1621_v43 = vmul.f32 %v3893_v6, %v3889_v23  ;;  %v1631_v56 = vmul.f32 %v3893_v6, %v3893_v6  ;;  %v1636_v26 = vmul.f32 %v3889_v23, %v3889_v23  ;;  %v1758_v17 = vmul.f32 %v1757_v41, %v3825_v13 }
 0x135   : > { %v1580_v61 = vadd.f32 %v1575_v57, %v3540_v52  ;;  %v1604_v58 = vadd.f32 %v1599_v60, %v3580_v12  ;;  %v1759_v51 = vmul.f32 %v1757_v41, %v3827_v14  ;;  %v1760_v33 = vmul.f32 %v1757_v41, %v3833_v2 }
 0x136   : > { %v1626_v46 = vadd.f32 %v1621_v43, %v1621_v43  ;;  %v1641_v38 = vsub.f32 %v1631_v56, %v1636_v26  ;;  %v1761_v24 = vmul.f32 %v1757_v41, %v3835_v19  ;;  %v3917_v18 = vadd.f32 %v1758_v17, %v1751_v10 }
 0x137   : > { %v1592_v62 = vadd.f32 %v1587_v32, %v1580_v61  ;;  %v1616_v20 = vadd.f32 %v1611_v44, %v1604_v58  ;;  %v3919_v30 = vadd.f32 %v1759_v51, %v1752_v3  ;;  %v3921_v54 = vadd.f32 %v1760_v33, %v1753_v22 }
 0x138   : > { %v1648_v52 = vmul.f32 %v3654_v35, %v1626_v46  ;;  %v1660_v12 = vmul.f32 %v3718_v42, %v1641_v38  ;;  %v1672_v21 = vmul.f32 %v3721_v59, %v1626_v46  ;;  %v1684_v25 = vmul.f32 %v3752_v4, %v1641_v38 }
 0x139   : > { %v1694_v16 = vmul.f32 %v1626_v46, %v3893_v6  ;;  %v1699_v11 = vmul.f32 %v1641_v38, %v3889_v23  ;;  %v1709_v10 = vmul.f32 %v1641_v38, %v3893_v6  ;;  %v1714_v50 = vmul.f32 %v1626_v46, %v3889_v23 }
 0x13a   : > { %v1653_v3 = vadd.f32 %v1648_v52, %v1592_v62  ;;  %v1677_v57 = vadd.f32 %v1672_v21, %v1616_v20  ;;  %v3931_v22 = vadd.f32 %v1761_v24, %v1754_v5  ;;  %v1768_v35 = vmul.f32 %v3799_v47, %v3519_v39 }
 0x13b   : > { %v1704_v42 = vadd.f32 %v1699_v11, %v1694_v16  ;;  %v1719_v59 = vsub.f32 %v1709_v10, %v1714_v50  ;;  %v1769_v4 = vmul.f32 %v3801_v9, %v3531_v27  ;;  %v1770_v32 = vmul.f32 %v3807_v36, %v3535_v40 }
 0x13c   : > { %v1665_v60 = vadd.f32 %v1660_v12, %v1653_v3  ;;  %v1689_v44 = vadd.f32 %v1684_v25, %v1677_v57  ;;  %v1771_v5 = vmul.f32 %v3809_v53, %v3686_v1  ;;  %v1773_v43 = vmul.f32 %v3825_v13, %v3373_v45 }
 0x13d   : > { %v1726_v56 = vmul.f32 %v3820_v28, %v1704_v42  ;;  %v1738_v26 = vmul.f32 %v3823_v15, %v1719_v59  ;;  %v1750_v17 = vmul.f32 %v3858_v48, %v1704_v42  ;;  %v1762_v61 = vmul.f32 %v1757_v41, %v1719_v59 }
 0x13e   : > { %v1772_v58 = vmul.f32 %v1704_v42, %v3893_v6  ;;  %v1774_v51 = vmul.f32 %v3827_v14, %v3511_v37  ;;  %v1775_v33 = vmul.f32 %v3833_v2, %v3527_v49  ;;  %v1776_v46 = vmul.f32 %v3835_v19, %v3682_v0 }
 0x13f   : > { %v1731_v38 = vadd.f32 %v1726_v56, %v1665_v60  ;;  %v1755_v24 = vadd.f32 %v1750_v17, %v1689_v44  ;;  %v1777_v28 = vmul.f32 %v1719_v59, %v3889_v23  ;;  %v3960_v62 = vadd.f32 %v1773_v43, %v1768_v35 }
 0x140   : > { %v3962_v15 = vadd.f32 %v1774_v51, %v1769_v4  ;;  %v3964_v48 = vadd.f32 %v1775_v33, %v1770_v32  ;;  %v3966_v41 = vadd.f32 %v1776_v46, %v1771_v5  ;;  %v1783_v20 = vmul.f32 %v3825_v13, %v3519_v39 }
 0x141   : > { %v1743_v52 = vadd.f32 %v1738_v26, %v1731_v38  ;;  %v1767_v12 = vadd.f32 %v1762_v61, %v1755_v24  ;;  %v3970_v21 = vadd.f32 %v1777_v28, %v1772_v58  ;;  %v1784_v25 = vmul.f32 %v3827_v14, %v3531_v27 }
 0x142   : > { %v1785_v16 = vmul.f32 %v3833_v2, %v3535_v40  ;;  %v1786_v11 = vmul.f32 %v3835_v19, %v3686_v1  ;;  %v1787_v10 = vmul.f32 %v1719_v59, %v3893_v6  ;;  %v1788_v50 = vmul.f32 %v3799_v47, %v3373_v45 }
 0x143   : > { %v1789_v13 = vmul.f32 %v3801_v9, %v3511_v37  ;;  %v1790_v3 = vmul.f32 %v3807_v36, %v3527_v49  ;;  %v1791_v14 = vmul.f32 %v3809_v53, %v3682_v0  ;;  %v1792_v57 = vmul.f32 %v1704_v42, %v3889_v23 }
 0x144   : > { %v1793_v2 = vsub.f32 %v1783_v20, %v1788_v50  ;;  %v1799_v35 = vstv %s3935_s22  ;;  %v1811_v4 = vstv %s3947_s27  ;;  %v1823_v19 = vstv %s3941_s23  ;;  %s4400_s22 = sld [smem:[#allocation9 + $0x11]] }
 0x145   : > { %v1794_v59 = vsub.f32 %v1784_v25, %v1789_v13  ;;  %v1795_v32 = vsub.f32 %v1785_v16, %v1790_v3  ;;  %v3993_v47 = vsub.f32 %v1786_v11, %v1791_v14  ;;  %v3995_v60 = vsub.f32 %v1787_v10, %v1792_v57  ;;  %s4437_s23 = sld [smem:[#allocation7 + $0x8]] }
 0x146   : > { %v1800_v9 = vmul.f32 %v1799_v35, %v3960_v62  ;;  %v1801_v36 = vmul.f32 %v1799_v35, %v3962_v15  ;;  %v1802_v53 = vmul.f32 %v1799_v35, %v3964_v48  ;;  %v1803_v42 = vmul.f32 %v1799_v35, %v3966_v41  ;;  %s4442_s27 = sld [smem:[#allocation9 + $0x8]] }
 0x147   : > { %v1804_v44 = vmul.f32 %v1799_v35, %v3970_v21  ;;  %v1812_v5 = vmul.f32 %v1811_v4, %v1793_v2  ;;  %v1813_v43 = vmul.f32 %v1811_v4, %v1794_v59  ;;  %v1814_v56 = vmul.f32 %v1811_v4, %v1795_v32 }
 0x148   : > { %v1805_v26 = vadd.f32 %v1800_v9, %v3853_v8  ;;  %v1806_v17 = vadd.f32 %v1801_v36, %v3855_v55  ;;  %v1807_v61 = vadd.f32 %v1802_v53, %v3860_v29  ;;  %v1808_v58 = vadd.f32 %v1803_v42, %v3862_v63 }
 0x149   : > { %v1809_v51 = vadd.f32 %v1804_v44, %v1743_v52  ;;  %v1815_v33 = vmul.f32 %v1811_v4, %v3993_v47  ;;  %v1816_v46 = vmul.f32 %v1811_v4, %v3995_v60  ;;  %v1824_v38 = vmul.f32 %v1823_v19, %v3960_v62 }
 0x14a   : > { %v4009_v24 = vadd.f32 %v1812_v5, %v1805_v26  ;;  %v4011_v28 = vadd.f32 %v1813_v43, %v1806_v17  ;;  %v4013_v20 = vadd.f32 %v1814_v56, %v1807_v61  ;;  %v1825_v8 = vmul.f32 %v1823_v19, %v3962_v15 }
 0x14b   : > { %v4016_v55 = vadd.f32 %v1815_v33, %v1808_v58  ;;  %v4018_v29 = vadd.f32 %v1816_v46, %v1809_v51  ;;  %v1826_v63 = vmul.f32 %v1823_v19, %v3964_v48  ;;  %v1827_v52 = vmul.f32 %v1823_v19, %v3966_v41 }
 0x14c   : > { %v1828_v25 = vmul.f32 %v1823_v19, %v3970_v21  ;;  %v1829_v16 = vadd.f32 %v1824_v38, %v3917_v18  ;;  %v1830_v11 = vadd.f32 %v1825_v8, %v3919_v30  ;;  %v1835_v10 = vstv %s3991_s28  ;;  %s4486_s28 = sld [smem:[#allocation7 + $0x12]] }
 0x14d   : > { %v1831_v50 = vadd.f32 %v1826_v63, %v3921_v54  ;;  %v1832_v13 = vadd.f32 %v1827_v52, %v3931_v22  ;;  %v1836_v3 = vmul.f32 %v1835_v10, %v1793_v2  ;;  %v1837_v14 = vmul.f32 %v1835_v10, %v1794_v59 }
 0x14e   : > { %v1833_v57 = vadd.f32 %v1828_v25, %v1767_v12  ;;  %v1838_v35 = vmul.f32 %v1835_v10, %v1795_v32  ;;  %v1839_v4 = vmul.f32 %v1835_v10, %v3993_v47  ;;  %v1840_v9 = vmul.f32 %v1835_v10, %v3995_v60 }
 0x14f   : > { %v4034_v18 = vadd.f32 %v1836_v3, %v1829_v16  ;;  %v4036_v30 = vadd.f32 %v1837_v14, %v1830_v11  ;;  %v1846_v54 = vmul.f32 %v3960_v62, %v3519_v39  ;;  %v1847_v22 = vmul.f32 %v3962_v15, %v3531_v27 }
 0x150   : > { %v4042_v19 = vadd.f32 %v1838_v35, %v1831_v50  ;;  %v4044_v12 = vadd.f32 %v1839_v4, %v1832_v13  ;;  %v4046_v36 = vadd.f32 %v1840_v9, %v1833_v57  ;;  %v1848_v53 = vmul.f32 %v3964_v48, %v3535_v40 }
 0x151   : > { %v1849_v42 = vmul.f32 %v3966_v41, %v3686_v1  ;;  %v1850_v44 = vmul.f32 %v3970_v21, %v3893_v6  ;;  %v1851_v5 = vmul.f32 %v1793_v2, %v3373_v45  ;;  %v1852_v43 = vmul.f32 %v1794_v59, %v3511_v37 }
 0x152   : > { %v1853_v56 = vmul.f32 %v1795_v32, %v3527_v49  ;;  %v1854_v26 = vmul.f32 %v3993_v47, %v3682_v0  ;;  %v1855_v17 = vmul.f32 %v3995_v60, %v3889_v23  ;;  %v1861_v61 = vmul.f32 %v1793_v2, %v3519_v39 }
 0x153   : > { %v4062_v58 = vadd.f32 %v1851_v5, %v1846_v54  ;;  %v4064_v51 = vadd.f32 %v1852_v43, %v1847_v22  ;;  %v1862_v33 = vmul.f32 %v1794_v59, %v3531_v27  ;;  %v1863_v46 = vmul.f32 %v1795_v32, %v3535_v40 }
 0x154   : > { %v4068_v38 = vadd.f32 %v1853_v56, %v1848_v53  ;;  %v4070_v8 = vadd.f32 %v1854_v26, %v1849_v42  ;;  %v4072_v63 = vadd.f32 %v1855_v17, %v1850_v44  ;;  %v1864_v52 = vmul.f32 %v3993_v47, %v3686_v1 }
 0x155   : > { %v1865_v2 = vmul.f32 %v3995_v60, %v3893_v6  ;;  %v1866_v25 = vmul.f32 %v3960_v62, %v3373_v45  ;;  %v1867_v59 = vmul.f32 %v3962_v15, %v3511_v37  ;;  %v1868_v32 = vmul.f32 %v3964_v48, %v3527_v49 }
 0x156   : > { %v1869_v16 = vmul.f32 %v3966_v41, %v3682_v0  ;;  %v1870_v47 = vmul.f32 %v3970_v21, %v3889_v23  ;;  %v1877_v11 = vstv %s4028_s29  ;;  %v1889_v10 = vstv %s4032_s8  ;;  %s4502_s29 = sld [smem:[#allocation9 + $0x12]] }
 0x157   : > { %v1871_v60 = vsub.f32 %v1861_v61, %v1866_v25  ;;  %v1872_v50 = vsub.f32 %v1862_v33, %v1867_v59  ;;  %v1873_v13 = vsub.f32 %v1863_v46, %v1868_v32  ;;  %v1878_v62 = vmul.f32 %v1877_v11, %v4062_v58  ;;  %s4539_s8 = sld [smem:[#allocation7 + $0x9]] }
 0x158   : > { %v4095_v3 = vsub.f32 %v1864_v52, %v1869_v16  ;;  %v4097_v15 = vsub.f32 %v1865_v2, %v1870_v47  ;;  %v1879_v48 = vmul.f32 %v1877_v11, %v4064_v51  ;;  %v1880_v41 = vmul.f32 %v1877_v11, %v4068_v38 }
 0x159   : > { %v1881_v21 = vmul.f32 %v1877_v11, %v4070_v8  ;;  %v1882_v14 = vmul.f32 %v1877_v11, %v4072_v63  ;;  %v1883_v57 = vadd.f32 %v1878_v62, %v4009_v24  ;;  %v1890_v35 = vmul.f32 %v1889_v10, %v1871_v60 }
 0x15a   : > { %v1884_v4 = vadd.f32 %v1879_v48, %v4011_v28  ;;  %v1885_v9 = vadd.f32 %v1880_v41, %v4013_v20  ;;  %v1891_v54 = vmul.f32 %v1889_v10, %v1872_v50  ;;  %v1892_v22 = vmul.f32 %v1889_v10, %v1873_v13 }
 0x15b   : > { %v1886_v53 = vadd.f32 %v1881_v21, %v4016_v55  ;;  %v1887_v42 = vadd.f32 %v1882_v14, %v4018_v29  ;;  %v1893_v44 = vmul.f32 %v1889_v10, %v4095_v3  ;;  %v1894_v5 = vmul.f32 %v1889_v10, %v4097_v15 }
 0x15c   : > { %v4110_v43 = vadd.f32 %v1890_v35, %v1883_v57  ;;  %v4112_v56 = vadd.f32 %v1891_v54, %v1884_v4  ;;  %v4114_v24 = vadd.f32 %v1892_v22, %v1885_v9  ;;  %v1901_v28 = vstv %s4076_s30  ;;  %s4544_s30 = sld [smem:[#allocation7 + $0x13]] }
 0x15d   : > { %v4117_v26 = vadd.f32 %v1893_v44, %v1886_v53  ;;  %v4119_v20 = vadd.f32 %v1894_v5, %v1887_v42  ;;  %v1902_v17 = vmul.f32 %v1901_v28, %v4062_v58  ;;  %v1903_v55 = vmul.f32 %v1901_v28, %v4064_v51 }
 0x15e   : > { %v1904_v29 = vmul.f32 %v1901_v28, %v4068_v38  ;;  %v1905_v61 = vmul.f32 %v1901_v28, %v4070_v8  ;;  %v1906_v33 = vmul.f32 %v1901_v28, %v4072_v63  ;;  %v1913_v46 = vstv %s4092_s10  ;;  %s4552_s10 = sld [smem:[#allocation9 + $0x9]] }
 0x15f   : > { %v1907_v52 = vadd.f32 %v1902_v17, %v4034_v18  ;;  %v1908_v2 = vadd.f32 %v1903_v55, %v4036_v30  ;;  %v1914_v25 = vmul.f32 %v1913_v46, %v1871_v60  ;;  %v1915_v59 = vmul.f32 %v1913_v46, %v1872_v50 }
 0x160   : > { %v1909_v32 = vadd.f32 %v1904_v29, %v4042_v19  ;;  %v1910_v16 = vadd.f32 %v1905_v61, %v4044_v12  ;;  %v1911_v47 = vadd.f32 %v1906_v33, %v4046_v36  ;;  %v1916_v11 = vmul.f32 %v1913_v46, %v1873_v13 }
 0x161   : > { %v1917_v10 = vmul.f32 %v1913_v46, %v4095_v3  ;;  %v1918_v62 = vmul.f32 %v1913_v46, %v4097_v15  ;;  %v4138_v18 = vadd.f32 %v1914_v25, %v1907_v52  ;;  %v4140_v30 = vadd.f32 %v1915_v59, %v1908_v2 }
 0x162   : > { %v4144_v48 = vadd.f32 %v1916_v11, %v1909_v32  ;;  %v1924_v19 = vmul.f32 %v4062_v58, %v3519_v39  ;;  %v1925_v12 = vmul.f32 %v4064_v51, %v3531_v27  ;;  %v1926_v36 = vmul.f32 %v4068_v38, %v3535_v40 }
 0x163   : > { %v1922_v41 = vadd.f32 %v1917_v10, %v1910_v16  ;;  %v4152_v21 = vadd.f32 %v1918_v62, %v1911_v47  ;;  %v1927_v14 = vmul.f32 %v4070_v8, %v3686_v1  ;;  %v1928_v57 = vmul.f32 %v4072_v63, %v3893_v6 }
 0x164   : > { %v1929_v35 = vmul.f32 %v1871_v60, %v3373_v45  ;;  %v1930_v4 = vmul.f32 %v1872_v50, %v3511_v37  ;;  %v1931_v9 = vmul.f32 %v1873_v13, %v3527_v49  ;;  %v1932_v54 = vmul.f32 %v4095_v3, %v3682_v0 }
 0x165   : > { %v1933_v22 = vmul.f32 %v4097_v15, %v3889_v23  ;;  %v1939_v53 = vmul.f32 %v1871_v60, %v3519_v39  ;;  %v1940_v42 = vmul.f32 %v1872_v50, %v3531_v27  ;;  %v1941_v44 = vmul.f32 %v1873_v13, %v3535_v40 }
 0x166   : > { %v4168_v5 = vadd.f32 %v1929_v35, %v1924_v19  ;;  %v4170_v28 = vadd.f32 %v1930_v4, %v1925_v12  ;;  %v4172_v17 = vadd.f32 %v1931_v9, %v1926_v36  ;;  %v4174_v55 = vadd.f32 %v1932_v54, %v1927_v14 }
 0x167   : > { %v4176_v29 = vadd.f32 %v1933_v22, %v1928_v57  ;;  %v1942_v60 = vmul.f32 %v4095_v3, %v3686_v1  ;;  %v1943_v50 = vmul.f32 %v4097_v15, %v3893_v6  ;;  %v1944_v13 = vmul.f32 %v4062_v58, %v3373_v45 }
 0x168   : > { %v1945_v61 = vmul.f32 %v4064_v51, %v3511_v37  ;;  %v1946_v33 = vmul.f32 %v4068_v38, %v3527_v49  ;;  %v1947_v46 = vmul.f32 %v4070_v8, %v3682_v0  ;;  %v1948_v52 = vmul.f32 %v4072_v63, %v3889_v23 }
 0x169   : > { %v1949_v2 = vsub.f32 %v1939_v53, %v1944_v13  ;;  %v1955_v3 = vstv %s4129_s11  ;;  %v1967_v25 = vstv %s4142_s15  ;;  %v1979_v59 = vstv %s4134_s12  ;;  %s4597_s11 = sld [smem:[#allocation9 + $0x13]]  ;;  %s2611_s12 = smul.u32 80, %s4660_s24 }
 0x16a   : > { %v1950_v15 = vsub.f32 %v1940_v42, %v1945_v61  ;;  %v1951_v58 = vsub.f32 %v1941_v44, %v1946_v33  ;;  %v4197_v32 = vsub.f32 %v1942_v60, %v1947_v46  ;;  %v4199_v51 = vsub.f32 %v1943_v50, %v1948_v52 }
 0x16b   : > { %v1956_v38 = vmul.f32 %v1955_v3, %v4168_v5  ;;  %v1957_v16 = vmul.f32 %v1955_v3, %v4170_v28  ;;  %v1958_v8 = vmul.f32 %v1955_v3, %v4172_v17  ;;  %v1959_v63 = vmul.f32 %v1955_v3, %v4174_v55 }
 0x16c   : > { %v1960_v47 = vmul.f32 %v1955_v3, %v4176_v29  ;;  %v1968_v11 = vmul.f32 %v1967_v25, %v1949_v2  ;;  %v1969_v10 = vmul.f32 %v1967_v25, %v1950_v15  ;;  %v1970_v62 = vmul.f32 %v1967_v25, %v1951_v58 }
 0x16d   : > { %v1961_v19 = vadd.f32 %v1956_v38, %v4110_v43  ;;  %v1962_v12 = vadd.f32 %v1957_v16, %v4112_v56  ;;  %v1963_v36 = vadd.f32 %v1958_v8, %v4114_v24  ;;  %v1964_v14 = vadd.f32 %v1959_v63, %v4117_v26 }
 0x16e   : > { %v1965_v57 = vadd.f32 %v1960_v47, %v4119_v20  ;;  %v1971_v35 = vmul.f32 %v1967_v25, %v4197_v32  ;;  %v1972_v4 = vmul.f32 %v1967_v25, %v4199_v51  ;;  %v1980_v9 = vmul.f32 %v1979_v59, %v4168_v5 }
 0x16f   : > { %v4214_v54 = vadd.f32 %v1968_v11, %v1961_v19  ;;  %v4216_v22 = vadd.f32 %v1969_v10, %v1962_v12  ;;  %v4218_v43 = vadd.f32 %v1970_v62, %v1963_v36  ;;  %v1981_v56 = vmul.f32 %v1979_v59, %v4170_v28 }
 0x170   : > { %v4221_v24 = vadd.f32 %v1971_v35, %v1964_v14  ;;  %v4223_v26 = vadd.f32 %v1972_v4, %v1965_v57  ;;  %v1982_v20 = vmul.f32 %v1979_v59, %v4172_v17  ;;  %v1983_v53 = vmul.f32 %v1979_v59, %v4174_v55 }
 0x171   : > { %v1984_v42 = vmul.f32 %v1979_v59, %v4176_v29  ;;  %v1985_v44 = vadd.f32 %v1980_v9, %v4138_v18  ;;  %v1986_v60 = vadd.f32 %v1981_v56, %v4140_v30  ;;  %v1991_v50 = vstv %s4195_s16  ;;  %s398_s16 = scalar_lea.vmem %s4633_s7, %s2611_s12 }
 0x172   : > { %v1987_v13 = vadd.f32 %v1982_v20, %v4144_v48  ;;  %v1988_v61 = vadd.f32 %v1983_v53, %v1922_v41  ;;  %v1992_v33 = vmul.f32 %v1991_v50, %v1949_v2  ;;  %v1993_v46 = vmul.f32 %v1991_v50, %v1950_v15 }
 0x173   : > { %v1989_v52 = vadd.f32 %v1984_v42, %v4152_v21  ;;  %v1994_v3 = vmul.f32 %v1991_v50, %v1951_v58  ;;  %v1995_v25 = vmul.f32 %v1991_v50, %v4197_v32  ;;  %v1996_v38 = vmul.f32 %v1991_v50, %v4199_v51 }
 0x174   : > { %v4239_v18 = vadd.f32 %v1992_v33, %v1985_v44  ;;  %v4241_v30 = vadd.f32 %v1993_v46, %v1986_v60  ;;  %v2002_v48 = vmul.f32 %v4168_v5, %v3519_v39  ;;  %v2003_v41 = vmul.f32 %v4170_v28, %v3531_v27 }
 0x175   : > { %v4247_v59 = vadd.f32 %v1994_v3, %v1987_v13  ;;  %v4249_v21 = vadd.f32 %v1995_v25, %v1988_v61  ;;  %v4251_v16 = vadd.f32 %v1996_v38, %v1989_v52  ;;  %v2004_v8 = vmul.f32 %v4172_v17, %v3535_v40 }
 0x176   : > { %v2005_v63 = vmul.f32 %v4174_v55, %v3686_v1  ;;  %v2006_v47 = vmul.f32 %v4176_v29, %v3893_v6  ;;  %v2007_v11 = vmul.f32 %v1949_v2, %v3373_v45  ;;  %v2008_v10 = vmul.f32 %v1950_v15, %v3511_v37 }
 0x177   : > { %v2009_v62 = vmul.f32 %v1951_v58, %v3527_v49  ;;  %v2010_v19 = vmul.f32 %v4197_v32, %v3682_v0  ;;  %v2011_v12 = vmul.f32 %v4199_v51, %v3889_v23  ;;  %v2017_v36 = vmul.f32 %v1949_v2, %v3519_v39 }
 0x178   : > { %v4267_v14 = vadd.f32 %v2007_v11, %v2002_v48  ;;  %v4269_v57 = vadd.f32 %v2008_v10, %v2003_v41  ;;  %v2018_v35 = vmul.f32 %v1950_v15, %v3531_v27  ;;  %v2019_v4 = vmul.f32 %v1951_v58, %v3535_v40 }
 0x179   : > { %v4273_v9 = vadd.f32 %v2009_v62, %v2004_v8  ;;  %v4275_v56 = vadd.f32 %v2010_v19, %v2005_v63  ;;  %v4277_v20 = vadd.f32 %v2011_v12, %v2006_v47  ;;  %v2020_v53 = vmul.f32 %v4197_v32, %v3686_v1 }
 0x17a   : > { %v2021_v2 = vmul.f32 %v4199_v51, %v3893_v6  ;;  %v2022_v42 = vmul.f32 %v4168_v5, %v3373_v45  ;;  %v2023_v15 = vmul.f32 %v4170_v28, %v3511_v37  ;;  %v2024_v58 = vmul.f32 %v4172_v17, %v3527_v49 }
 0x17b   : > { %v2025_v44 = vmul.f32 %v4174_v55, %v3682_v0  ;;  %v2026_v32 = vmul.f32 %v4176_v29, %v3889_v23  ;;  %v2033_v60 = vstv %s4232_s17  ;;  %v2045_v50 = vstv %s4237_s18 }
 0x17c   : > { %v2027_v51 = vsub.f32 %v2017_v36, %v2022_v42  ;;  %v2028_v13 = vsub.f32 %v2018_v35, %v2023_v15  ;;  %v2029_v61 = vsub.f32 %v2019_v4, %v2024_v58  ;;  %v2034_v5 = vmul.f32 %v2033_v60, %v4267_v14 }
 0x17d   : > { %v4300_v33 = vsub.f32 %v2020_v53, %v2025_v44  ;;  %v4302_v28 = vsub.f32 %v2021_v2, %v2026_v32  ;;  %v2035_v17 = vmul.f32 %v2033_v60, %v4269_v57  ;;  %v2036_v55 = vmul.f32 %v2033_v60, %v4273_v9 }
 0x17e   : > { %v2037_v29 = vmul.f32 %v2033_v60, %v4275_v56  ;;  %v2038_v46 = vmul.f32 %v2033_v60, %v4277_v20  ;;  %v2039_v52 = vadd.f32 %v2034_v5, %v4214_v54  ;;  %v2046_v3 = vmul.f32 %v2045_v50, %v2027_v51 }
 0x17f   : > { %v2040_v25 = vadd.f32 %v2035_v17, %v4216_v22  ;;  %v2041_v38 = vadd.f32 %v2036_v55, %v4218_v43  ;;  %v2047_v48 = vmul.f32 %v2045_v50, %v2028_v13  ;;  %v2048_v41 = vmul.f32 %v2045_v50, %v2029_v61 }
 0x180   : > { %v2042_v8 = vadd.f32 %v2037_v29, %v4221_v24  ;;  %v2043_v63 = vadd.f32 %v2038_v46, %v4223_v26  ;;  %v2049_v47 = vmul.f32 %v2045_v50, %v4300_v33  ;;  %v2050_v11 = vmul.f32 %v2045_v50, %v4302_v28 }
 0x181   : > { %v4315_v10 = vadd.f32 %v2046_v3, %v2039_v52  ;;  %v4317_v62 = vadd.f32 %v2047_v48, %v2040_v25  ;;  %v4319_v54 = vadd.f32 %v2048_v41, %v2041_v38  ;;  %v2057_v22 = vstv %s4281_s19 }
 0x182   : > { %v4322_v19 = vadd.f32 %v2049_v47, %v2042_v8  ;;  %v4324_v43 = vadd.f32 %v2050_v11, %v2043_v63  ;;  %v2058_v12 = vmul.f32 %v2057_v22, %v4267_v14  ;;  %v2059_v24 = vmul.f32 %v2057_v22, %v4269_v57 }
 0x183   : > { %v2060_v26 = vmul.f32 %v2057_v22, %v4273_v9  ;;  %v2061_v36 = vmul.f32 %v2057_v22, %v4275_v56  ;;  %v2062_v35 = vmul.f32 %v2057_v22, %v4277_v20  ;;  %v2069_v4 = vstv %s4297_s9 }
 0x184   : > { %v2063_v53 = vadd.f32 %v2058_v12, %v4239_v18  ;;  %v2064_v2 = vadd.f32 %v2059_v24, %v4241_v30  ;;  %v2070_v42 = vmul.f32 %v2069_v4, %v2027_v51  ;;  %v2071_v15 = vmul.f32 %v2069_v4, %v2028_v13 }
 0x185   : > { %v2065_v58 = vadd.f32 %v2060_v26, %v4247_v59  ;;  %v2066_v44 = vadd.f32 %v2061_v36, %v4249_v21  ;;  %v2067_v32 = vadd.f32 %v2062_v35, %v4251_v16  ;;  %v2072_v60 = vmul.f32 %v2069_v4, %v2029_v61 }
 0x186   : > { %v2073_v50 = vmul.f32 %v2069_v4, %v4300_v33  ;;  %v2074_v5 = vmul.f32 %v2069_v4, %v4302_v28  ;;  %v4343_v18 = vadd.f32 %v2070_v42, %v2063_v53  ;;  %v4345_v30 = vadd.f32 %v2071_v15, %v2064_v2 }
 0x187   : > { %v4349_v17 = vadd.f32 %v2072_v60, %v2065_v58  ;;  %v2080_v59 = vmul.f32 %v4267_v14, %v3519_v39  ;;  %v2081_v21 = vmul.f32 %v4269_v57, %v3531_v27  ;;  %v2082_v16 = vmul.f32 %v4273_v9, %v3535_v40 }
 0x188   : > { %v2078_v55 = vadd.f32 %v2073_v50, %v2066_v44  ;;  %v4357_v29 = vadd.f32 %v2074_v5, %v2067_v32  ;;  %v2083_v46 = vmul.f32 %v4275_v56, %v3686_v1  ;;  %v2084_v52 = vmul.f32 %v4277_v20, %v3893_v6 }
 0x189   : > { %v2085_v3 = vmul.f32 %v2027_v51, %v3373_v45  ;;  %v2086_v25 = vmul.f32 %v2028_v13, %v3511_v37  ;;  %v2087_v38 = vmul.f32 %v2029_v61, %v3527_v49  ;;  %v2088_v48 = vmul.f32 %v4300_v33, %v3682_v0 }
 0x18a   : > { %v2089_v41 = vmul.f32 %v4302_v28, %v3889_v23  ;;  %v2095_v8 = vmul.f32 %v2027_v51, %v3519_v39  ;;  %v2096_v63 = vmul.f32 %v2028_v13, %v3531_v27  ;;  %v2097_v47 = vmul.f32 %v2029_v61, %v3535_v40 }
 0x18b   : > { %v4373_v11 = vadd.f32 %v2085_v3, %v2080_v59  ;;  %v4375_v22 = vadd.f32 %v2086_v25, %v2081_v21  ;;  %v4377_v12 = vadd.f32 %v2087_v38, %v2082_v16  ;;  %v4379_v24 = vadd.f32 %v2088_v48, %v2083_v46 }
 0x18c   : > { %v4381_v26 = vadd.f32 %v2089_v41, %v2084_v52  ;;  %v2098_v51 = vmul.f32 %v4300_v33, %v3686_v1  ;;  %v2099_v13 = vmul.f32 %v4302_v28, %v3893_v6  ;;  %v2100_v61 = vmul.f32 %v4267_v14, %v3373_v45 }
 0x18d   : > { %v2101_v36 = vmul.f32 %v4269_v57, %v3511_v37  ;;  %v2102_v35 = vmul.f32 %v4273_v9, %v3527_v49  ;;  %v2103_v4 = vmul.f32 %v4275_v56, %v3682_v0  ;;  %v2104_v53 = vmul.f32 %v4277_v20, %v3889_v23 }
 0x18e   : > { %v2105_v2 = vsub.f32 %v2095_v8, %v2100_v61  ;;  %v2111_v33 = vstv %s4334_s13  ;;  %v2123_v42 = vstv %s4347_s21  ;;  %v2135_v15 = vstv %s4339_s20 }
 0x18f   : > { %v2106_v28 = vsub.f32 %v2096_v63, %v2101_v36  ;;  %v2107_v14 = vsub.f32 %v2097_v47, %v2102_v35  ;;  %v4402_v58 = vsub.f32 %v2098_v51, %v2103_v4  ;;  %v4404_v57 = vsub.f32 %v2099_v13, %v2104_v53 }
 0x190   : > { %v2112_v9 = vmul.f32 %v2111_v33, %v4373_v11  ;;  %v2113_v44 = vmul.f32 %v2111_v33, %v4375_v22  ;;  %v2114_v56 = vmul.f32 %v2111_v33, %v4377_v12  ;;  %v2115_v20 = vmul.f32 %v2111_v33, %v4379_v24 }
 0x191   : > { %v2116_v32 = vmul.f32 %v2111_v33, %v4381_v26  ;;  %v2124_v60 = vmul.f32 %v2123_v42, %v2105_v2  ;;  %v2125_v50 = vmul.f32 %v2123_v42, %v2106_v28  ;;  %v2126_v5 = vmul.f32 %v2123_v42, %v2107_v14 }
 0x192   : > { %v2117_v59 = vadd.f32 %v2112_v9, %v4315_v10  ;;  %v2118_v21 = vadd.f32 %v2113_v44, %v4317_v62  ;;  %v2119_v16 = vadd.f32 %v2114_v56, %v4319_v54  ;;  %v2120_v46 = vadd.f32 %v2115_v20, %v4322_v19 }
 0x193   : > { %v2121_v52 = vadd.f32 %v2116_v32, %v4324_v43  ;;  %v2127_v3 = vmul.f32 %v2123_v42, %v4402_v58  ;;  %v2128_v25 = vmul.f32 %v2123_v42, %v4404_v57  ;;  %v2136_v38 = vmul.f32 %v2135_v15, %v4373_v11 }
 0x194   : > { %v4419_v48 = vadd.f32 %v2124_v60, %v2117_v59  ;;  %v4421_v41 = vadd.f32 %v2125_v50, %v2118_v21  ;;  %v4423_v10 = vadd.f32 %v2126_v5, %v2119_v16  ;;  %v2137_v62 = vmul.f32 %v2135_v15, %v4375_v22 }
 0x195   : > { %v4426_v54 = vadd.f32 %v2127_v3, %v2120_v46  ;;  %v4428_v19 = vadd.f32 %v2128_v25, %v2121_v52  ;;  %v2138_v43 = vmul.f32 %v2135_v15, %v4377_v12  ;;  %v2139_v8 = vmul.f32 %v2135_v15, %v4379_v24 }
 0x196   : > { %v2140_v63 = vmul.f32 %v2135_v15, %v4381_v26  ;;  %v2141_v47 = vadd.f32 %v2136_v38, %v4343_v18  ;;  %v2142_v51 = vadd.f32 %v2137_v62, %v4345_v30  ;;  %v2147_v13 = vstv %s4400_s22 }
 0x197   : > { %v2143_v61 = vadd.f32 %v2138_v43, %v4349_v17  ;;  %v2144_v36 = vadd.f32 %v2139_v8, %v2078_v55  ;;  %v2148_v35 = vmul.f32 %v2147_v13, %v2105_v2  ;;  %v2149_v4 = vmul.f32 %v2147_v13, %v2106_v28 }
 0x198   : > { %v2145_v53 = vadd.f32 %v2140_v63, %v4357_v29  ;;  %v2150_v33 = vmul.f32 %v2147_v13, %v2107_v14  ;;  %v2151_v42 = vmul.f32 %v2147_v13, %v4402_v58  ;;  %v2152_v9 = vmul.f32 %v2147_v13, %v4404_v57 }
 0x199   : > { %v4444_v18 = vadd.f32 %v2148_v35, %v2141_v47  ;;  %v4446_v30 = vadd.f32 %v2149_v4, %v2142_v51  ;;  %v2158_v17 = vmul.f32 %v4373_v11, %v3519_v39  ;;  %v2159_v55 = vmul.f32 %v4375_v22, %v3531_v27 }
 0x19a   : > { %v4452_v15 = vadd.f32 %v2150_v33, %v2143_v61  ;;  %v4454_v29 = vadd.f32 %v2151_v42, %v2144_v36  ;;  %v4456_v44 = vadd.f32 %v2152_v9, %v2145_v53  ;;  %v2160_v56 = vmul.f32 %v4377_v12, %v3535_v40 }
 0x19b   : > { %v2161_v20 = vmul.f32 %v4379_v24, %v3686_v1  ;;  %v2162_v32 = vmul.f32 %v4381_v26, %v3893_v6  ;;  %v2163_v60 = vmul.f32 %v2105_v2, %v3373_v45  ;;  %v2164_v50 = vmul.f32 %v2106_v28, %v3511_v37 }
 0x19c   : > { %v2165_v5 = vmul.f32 %v2107_v14, %v3527_v49  ;;  %v2166_v59 = vmul.f32 %v4402_v58, %v3682_v0  ;;  %v2167_v21 = vmul.f32 %v4404_v57, %v3889_v23  ;;  %v2173_v16 = vmul.f32 %v2105_v2, %v3519_v39 }
 0x19d   : > { %v4472_v46 = vadd.f32 %v2163_v60, %v2158_v17  ;;  %v4474_v52 = vadd.f32 %v2164_v50, %v2159_v55  ;;  %v2174_v3 = vmul.f32 %v2106_v28, %v3531_v27  ;;  %v2175_v25 = vmul.f32 %v2107_v14, %v3535_v40 }
 0x19e   : > { %v4478_v38 = vadd.f32 %v2165_v5, %v2160_v56  ;;  %v4480_v62 = vadd.f32 %v2166_v59, %v2161_v20  ;;  %v4482_v43 = vadd.f32 %v2167_v21, %v2162_v32  ;;  %v2176_v8 = vmul.f32 %v4402_v58, %v3686_v1 }
 0x19f   : > { %v2177_v2 = vmul.f32 %v4404_v57, %v3893_v6  ;;  %v2178_v63 = vmul.f32 %v4373_v11, %v3373_v45  ;;  %v2179_v28 = vmul.f32 %v4375_v22, %v3511_v37  ;;  %v2180_v14 = vmul.f32 %v4377_v12, %v3527_v49 }
 0x1a0   : > { %v2181_v47 = vmul.f32 %v4379_v24, %v3682_v0  ;;  %v2182_v58 = vmul.f32 %v4381_v26, %v3889_v23  ;;  %v2189_v51 = vstv %s4437_s23  ;;  %v2201_v13 = vstv %s4442_s27 }
 0x1a1   : > { %v2183_v57 = vsub.f32 %v2173_v16, %v2178_v63  ;;  %v2184_v61 = vsub.f32 %v2174_v3, %v2179_v28  ;;  %v2185_v36 = vsub.f32 %v2175_v25, %v2180_v14  ;;  %v2190_v11 = vmul.f32 %v2189_v51, %v4472_v46 }
 0x1a2   : > { %v4505_v35 = vsub.f32 %v2176_v8, %v2181_v47  ;;  %v4507_v22 = vsub.f32 %v2177_v2, %v2182_v58  ;;  %v2191_v12 = vmul.f32 %v2189_v51, %v4474_v52  ;;  %v2192_v24 = vmul.f32 %v2189_v51, %v4478_v38 }
 0x1a3   : > { %v2193_v26 = vmul.f32 %v2189_v51, %v4480_v62  ;;  %v2194_v4 = vmul.f32 %v2189_v51, %v4482_v43  ;;  %v2195_v53 = vadd.f32 %v2190_v11, %v4419_v48  ;;  %v2202_v33 = vmul.f32 %v2201_v13, %v2183_v57 }
 0x1a4   : > { %v2196_v42 = vadd.f32 %v2191_v12, %v4421_v41  ;;  %v2197_v9 = vadd.f32 %v2192_v24, %v4423_v10  ;;  %v2203_v17 = vmul.f32 %v2201_v13, %v2184_v61  ;;  %v2204_v55 = vmul.f32 %v2201_v13, %v2185_v36 }
 0x1a5   : > { %v2198_v56 = vadd.f32 %v2193_v26, %v4426_v54  ;;  %v2199_v20 = vadd.f32 %v2194_v4, %v4428_v19  ;;  %v2205_v32 = vmul.f32 %v2201_v13, %v4505_v35  ;;  %v2206_v60 = vmul.f32 %v2201_v13, %v4507_v22 }
 0x1a6   : > { %v4520_v50 = vadd.f32 %v2202_v33, %v2195_v53  ;;  %v4522_v5 = vadd.f32 %v2203_v17, %v2196_v42  ;;  %v4524_v48 = vadd.f32 %v2204_v55, %v2197_v9  ;;  %v2213_v41 = vstv %s4486_s28 }
 0x1a7   : > { %v4527_v59 = vadd.f32 %v2205_v32, %v2198_v56  ;;  %v4529_v10 = vadd.f32 %v2206_v60, %v2199_v20  ;;  %v2214_v21 = vmul.f32 %v2213_v41, %v4472_v46  ;;  %v2215_v54 = vmul.f32 %v2213_v41, %v4474_v52 }
 0x1a8   : > { %v2216_v19 = vmul.f32 %v2213_v41, %v4478_v38  ;;  %v2217_v16 = vmul.f32 %v2213_v41, %v4480_v62  ;;  %v2218_v3 = vmul.f32 %v2213_v41, %v4482_v43  ;;  %v2225_v25 = vstv %s4502_s29 }
 0x1a9   : > { %v2219_v8 = vadd.f32 %v2214_v21, %v4444_v18  ;;  %v2220_v2 = vadd.f32 %v2215_v54, %v4446_v30  ;;  %v2226_v63 = vmul.f32 %v2225_v25, %v2183_v57  ;;  %v2227_v28 = vmul.f32 %v2225_v25, %v2184_v61 }
 0x1aa   : > { %v2221_v14 = vadd.f32 %v2216_v19, %v4452_v15  ;;  %v2222_v47 = vadd.f32 %v2217_v16, %v4454_v29  ;;  %v2223_v58 = vadd.f32 %v2218_v3, %v4456_v44  ;;  %v2228_v51 = vmul.f32 %v2225_v25, %v2185_v36 }
 0x1ab   : > { %v2229_v13 = vmul.f32 %v2225_v25, %v4505_v35  ;;  %v2230_v11 = vmul.f32 %v2225_v25, %v4507_v22  ;;  %v4548_v18 = vadd.f32 %v2226_v63, %v2219_v8  ;;  %v4550_v30 = vadd.f32 %v2227_v28, %v2220_v2 }
 0x1ac   : > { %v4554_v12 = vadd.f32 %v2228_v51, %v2221_v14  ;;  %v2236_v15 = vmul.f32 %v4472_v46, %v3519_v39  ;;  %v2237_v29 = vmul.f32 %v4474_v52, %v3531_v27  ;;  %v2238_v44 = vmul.f32 %v4478_v38, %v3535_v40 }
 0x1ad   : > { %v4562_v24 = vadd.f32 %v2229_v13, %v2222_v47  ;;  %v4564_v26 = vadd.f32 %v2230_v11, %v2223_v58  ;;  %v2239_v4 = vmul.f32 %v4480_v62, %v3686_v1  ;;  %v2240_v53 = vmul.f32 %v4482_v43, %v3893_v6 }
 0x1ae   : > { %v2241_v33 = vmul.f32 %v2183_v57, %v3373_v45  ;;  %v2242_v42 = vmul.f32 %v2184_v61, %v3511_v37  ;;  %v2243_v9 = vmul.f32 %v2185_v36, %v3527_v49  ;;  %v2244_v17 = vmul.f32 %v4505_v35, %v3682_v0 }
 0x1af   : > { %v2245_v55 = vmul.f32 %v4507_v22, %v3889_v23  ;;  %v2251_v56 = vmul.f32 %v2183_v57, %v3519_v39  ;;  %v2252_v20 = vmul.f32 %v2184_v61, %v3531_v27  ;;  %v2253_v32 = vmul.f32 %v2185_v36, %v3535_v40 }
 0x1b0   : > { %v2246_v60 = vadd.f32 %v2241_v33, %v2236_v15  ;;  %v2247_v41 = vadd.f32 %v2242_v42, %v2237_v29  ;;  %v2248_v21 = vadd.f32 %v2243_v9, %v2238_v44  ;;  %v2249_v54 = vadd.f32 %v2244_v17, %v2239_v4 }
 0x1b1   : > { %v2250_v19 = vadd.f32 %v2245_v55, %v2240_v53  ;;  %v2254_v16 = vmul.f32 %v4505_v35, %v3686_v1  ;;  %v2255_v3 = vmul.f32 %v4507_v22, %v3893_v6  ;;  %v2256_v39 = vmul.f32 %v4472_v46, %v3373_v45 }
 0x1b2   : > { %v2257_v27 = vmul.f32 %v4474_v52, %v3511_v37  ;;  %v2258_v40 = vmul.f32 %v4478_v38, %v3527_v49  ;;  %v2259_v57 = vmul.f32 %v4480_v62, %v3682_v0  ;;  %v2260_v61 = vmul.f32 %v4482_v43, %v3889_v23 }
 0x1b3   : > { %v2261_v36 = vsub.f32 %v2251_v56, %v2256_v39  ;;  %v2267_v1 = vstv %s4539_s8  ;;  %v2279_v35 = vstv %s4552_s10  ;;  %v2291_v25 = vstv %s4544_s30 }
 0x1b4   : > { %v2262_v6 = vsub.f32 %v2252_v20, %v2257_v27  ;;  %v2263_v45 = vsub.f32 %v2253_v32, %v2258_v40  ;;  %v2264_v46 = vsub.f32 %v2254_v16, %v2259_v57  ;;  %v2265_v22 = vsub.f32 %v2255_v3, %v2260_v61 }
 0x1b5   : > { %v2268_v37 = vmul.f32 %v2267_v1, %v2246_v60  ;;  %v2269_v52 = vmul.f32 %v2267_v1, %v2247_v41  ;;  %v2270_v8 = vmul.f32 %v2267_v1, %v2248_v21  ;;  %v2271_v49 = vmul.f32 %v2267_v1, %v2249_v54 }
 0x1b6   : > { %v2272_v38 = vmul.f32 %v2267_v1, %v2250_v19  ;;  %v2280_v2 = vmul.f32 %v2279_v35, %v2261_v36  ;;  %v2281_v0 = vmul.f32 %v2279_v35, %v2262_v6  ;;  %v2282_v62 = vmul.f32 %v2279_v35, %v2263_v45 }
 0x1b7   : > { %v2273_v23 = vadd.f32 %v2268_v37, %v4520_v50  ;;  %v2274_v43 = vadd.f32 %v2269_v52, %v4522_v5  ;;  %v2275_v63 = vadd.f32 %v2270_v8, %v4524_v48  ;;  %v2276_v28 = vadd.f32 %v2271_v49, %v4527_v59 }
 0x1b8   : > { %v2277_v14 = vadd.f32 %v2272_v38, %v4529_v10  ;;  %v2283_v47 = vmul.f32 %v2279_v35, %v2264_v46  ;;  %v2284_v58 = vmul.f32 %v2279_v35, %v2265_v22  ;;  %v2292_v51 = vmul.f32 %v2291_v25, %v2246_v60 }
 0x1b9   : > { %v2285_v13 = vadd.f32 %v2280_v2, %v2273_v23  ;;  %v2286_v11 = vadd.f32 %v2281_v0, %v2274_v43  ;;  %v2287_v15 = vadd.f32 %v2282_v62, %v2275_v63  ;;  %v2293_v29 = vmul.f32 %v2291_v25, %v2247_v41 }
 0x1ba   : > { %v2288_v44 = vadd.f32 %v2283_v47, %v2276_v28  ;;  %v2289_v4 = vadd.f32 %v2284_v58, %v2277_v14  ;;  %v2294_v50 = vmul.f32 %v2291_v25, %v2248_v21  ;;  %v2295_v53 = vmul.f32 %v2291_v25, %v2249_v54 }
 0x1bb   : > { %v2296_v5 = vmul.f32 %v2291_v25, %v2250_v19  ;;  %v2297_v48 = vadd.f32 %v2292_v51, %v4548_v18  ;;  %v2298_v59 = vadd.f32 %v2293_v29, %v4550_v30  ;;  %v2303_v33 = vstv %s4597_s11 }
 0x1bc   : > { %v2299_v10 = vadd.f32 %v2294_v50, %v4554_v12  ;;  %v2300_v42 = vadd.f32 %v2295_v53, %v4562_v24  ;;  %v2304_v9 = vmul.f32 %v2303_v33, %v2261_v36  ;;  %v2305_v17 = vmul.f32 %v2303_v33, %v2262_v6 }
 0x1bd   : > { %v2301_v55 = vadd.f32 %v2296_v5, %v4564_v26  ;;  %v2306_v56 = vmul.f32 %v2303_v33, %v2263_v45  ;;  %v2307_v20 = vmul.f32 %v2303_v33, %v2264_v46  ;;  %v2308_v32 = vmul.f32 %v2303_v33, %v2265_v22 }
 0x1be   : > { %v2309_v60 = vadd.f32 %v2304_v9, %v2297_v48  ;;  %v2310_v41 = vadd.f32 %v2305_v17, %v2298_v59  ;;  %v2317_v18 = vrot.slane %v502_v34, %v3009_v7 }
 0x1bf   : > { %v2311_v30 = vadd.f32 %v2306_v56, %v2299_v10  ;;  %v2312_v12 = vadd.f32 %v2307_v20, %v2300_v42  ;;  %v2313_v24 = vadd.f32 %v2308_v32, %v2301_v55 }
 0x1c0   : > { %v2318_v21 = vmul.f32 %v2317_v18, %v2285_v13  ;;  %v2319_v54 = vmul.f32 %v2317_v18, %v2286_v11  ;;  %v2320_v19 = vmul.f32 %v2317_v18, %v2287_v15  ;;  %v2321_v26 = vmul.f32 %v2317_v18, %v2288_v44 }
 0x1c1   : > { %v2322_v16 = vmul.f32 %v2317_v18, %v2289_v4  ;;  %v2328_v3 = vmul.f32 %v2317_v18, %v2309_v60  ;;  %v2329_v39 = vmul.f32 %v2317_v18, %v2310_v41  ;;  %v2330_v27 = vmul.f32 %v2317_v18, %v2311_v30 }
 0x1c2   : > { %2323 = vst [vmem:[%s398_s16] sm:$0xff] %v2318_v21  ;;  %2324 = vst [vmem:[%s398_s16 + $0x8] sm:$0xff] %v2319_v54  ;;  %v2331_v31 = vmul.f32 %v2317_v18, %v2312_v12  ;;  %v2332_v7 = vmul.f32 %v2317_v18, %v2313_v24 }
 0x1c3   : > { %2325 = vst [vmem:[%s398_s16 + $0x10] sm:$0xff] %v2320_v19  ;;  %2326 = vst [vmem:[%s398_s16 + $0x18] sm:$0xff] %v2321_v26 }
 0x1c4   : > { %2327 = vst [vmem:[%s398_s16 + $0x20] sm:$0x1] %v2322_v16  ;;  %2604 = vst [vmem:[%s398_s16 + $0x28] sm:$0xff] %v2328_v3 }
 0x1c5   : > { %2605 = vst [vmem:[%s398_s16 + $0x30] sm:$0xff] %v2329_v39  ;;  %2606 = vst [vmem:[%s398_s16 + $0x38] sm:$0xff] %v2330_v27 }
 0x1c6   : > { %2607 = vst [vmem:[%s398_s16 + $0x40] sm:$0xff] %v2331_v31  ;;  %2608 = vst [vmem:[%s398_s16 + $0x48] sm:$0x1] %v2332_v7 }
 0x1c7 PF: > { %s20_s26 = sadd.s32 1, %s2842_s26   ;;  %s4655_s24 = smov %s2838_s25 }
 0x1c8   : > { %p17_p8 = scmp.ge.s32.totalorder %s20_s26, 4   ;;  %s4656_s25 = smov %s4658_s14 }
 0x1ca   :  { %19 = sbr.rel (!%p17_p8) target bundleno = 4 (0x4), region = 103 }
 0x1cf   :  { %2367 = vsyncpa [#allocation3], 1 }
 0x1d0   :  { %2369 = vsyncpa [#allocation3 + $0x1], 1 }
 0x1d1   :  { %2370 = vsyncpa [#allocation5], 1 }
 0x1d2   :  { %2371 = vsyncpa [#allocation8], 1 }

</bundles_post_ra>
